<compile_context>
chip_gen: v7x
topology: tpu7x:2x2x1
jax: 0.10.0
libtpu: 0.0.40
codegen_flags: <defaults>
</compile_context>

<pallas_src>
import jax
import jax.numpy as jnp
from jax.experimental import pallas as pl
from jax.experimental.pallas import tpu as pltpu


# ----------------------------------------------------------------------------------
# Fused logit path: conv1 -> BN(folded)/ReLU -> conv2 -> per-phase sums -> prob
# ----------------------------------------------------------------------------------

def _phase_select_matrix(H, W, stride):
    """(P, H*W) 0/1 matrix: row p selects the pixels of polyphase component p."""
    s = stride
    P = s * s
    r = jnp.arange(H * W, dtype=jnp.int32)
    ph = ((r // W) % s) * s + ((r % W) % s)
    return (ph[None, :] == jnp.arange(P, dtype=jnp.int32)[:, None]).astype(jnp.float32)


def _phase_mix_from_w2(w2, stride):
    """Fold conv2 (3x3, circular pad, Cout=1, no bias) + per-phase spatial sum.

    For circular padding: sum_{pixels in phase p} conv2(h) = sum_{q,c} S[q, c] * B[q, c, p],
    where S are the per-phase channel sums of h.  Returns B of shape (P, hid, P)."""
    s = stride
    P = s * s
    hid = w2.shape[1]
    B = jnp.zeros((P, hid, P), jnp.float32)
    for p in range(P):
        pi, pj = p // s, p % s
        for kh in range(3):
            for kw in range(3):
                q = ((pi + kh - 1) % s) * s + ((pj + kw - 1) % s)
                B = B.at[q, :, p].add(w2[0, :, kh, kw].astype(jnp.float32))
    return B


def _make_logit_prob_kernel(H, W, Cin, hid, stride, mode, hard):
    s = stride
    P = s * s
    HW = H * W
    train = (mode == "train")
    soft = train and not hard

    def kernel(xpad_ref, w1_ref, b1_ref, msel_ref, bmix_ref, g_ref, itau_ref, prob_ref):
        # ---- conv1 as a single im2col matmul (bf16 operands, f32 accumulate, MXU) ----
        cols = []
        for kh in range(3):
            for kw in range(3):
                cols.append(xpad_ref[0, kh:kh + H, kw:kw + W, :].reshape(HW, Cin))
        im1 = jnp.concatenate(cols, axis=-1).astype(jnp.bfloat16)            # (HW, 9*Cin)
        h = jnp.dot(im1, w1_ref[...], preferred_element_type=jnp.float32)    # (HW, hid)
        h = jnp.maximum(h + b1_ref[...], 0.0)     # BN scale folded into w1; bias + ReLU

        # ---- per-phase sums of the hidden activation: one matmul with K = H*W ----
        S = jnp.dot(msel_ref[...], h, preferred_element_type=jnp.float32)    # (P, hid)

        # ---- conv2 + per-phase logit reduction folded into phase-mix matmuls ----
        score = jnp.zeros((1, P), jnp.float32)
        for q in range(P):
            score = score + jnp.dot(S[q:q + 1, :], bmix_ref[q],
                                    preferred_element_type=jnp.float32)      # (1, P)

        # ---- gumbel-softmax (train) / argmax one-hot (test) over the P phases ----
        if train:
            z = (score + g_ref[0]) * itau_ref[...]
        else:
            z = score
        zmax = jnp.max(z, axis=1, keepdims=True)
        if soft:
            ez = jnp.exp(z - zmax)
            prob = ez / jnp.sum(ez, axis=1, keepdims=True)
        else:
            ids = jax.lax.broadcasted_iota(jnp.int32, (1, P), 1)
            idx = jnp.min(jnp.where(z == zmax, ids, P), axis=1, keepdims=True)
            prob = (ids == idx).astype(jnp.float32)
        prob_ref[0] = prob

    return kernel


def lps_logit_prob_pallas(params, x_nhwc, *, stride, mode, hard, g, itau, padding_mode):
    if padding_mode != "circular":
        # TODO(synk): non-circular logits_pad needs a per-pixel conv2 path in the fused
        # kernel (the conv2/phase-sum folding is exact only for circular padding).
        raise NotImplementedError("fused LPS logit kernel supports circular padding only")
    N, H, W, Cin = x_nhwc.shape
    s = stride
    P = s * s
    hid = params["bn_bias"].shape[-1]
    # TODO(synk): conv1 input is still circularly padded via XLA (one extra copy of x in
    # HBM); could be moved in-kernel with a sublane concat/roll.
    xpad = jnp.pad(x_nhwc, ((0, 0), (1, 1), (1, 1), (0, 0)), mode="wrap")
    msel = _phase_select_matrix(H, W, s)

    return pl.pallas_call(
        _make_logit_prob_kernel(H, W, Cin, hid, s, mode, hard),
        out_shape=jax.ShapeDtypeStruct((N, 1, P), jnp.float32),
        grid=(N,),
        in_specs=[
            pl.BlockSpec((1, H + 2, W + 2, Cin), lambda n: (n, 0, 0, 0)),
            pl.BlockSpec((9 * Cin, hid), lambda n: (0, 0)),
            pl.BlockSpec((1, hid), lambda n: (0, 0)),
            pl.BlockSpec((P, H * W), lambda n: (0, 0)),
            pl.BlockSpec((P, hid, P), lambda n: (0, 0, 0)),
            pl.BlockSpec((1, 1, P), lambda n: (n, 0, 0)),
            pl.BlockSpec((1, 1), lambda n: (0, 0)),
        ],
        out_specs=pl.BlockSpec((1, 1, P), lambda n: (n, 0, 0)),
        compiler_params=pltpu.CompilerParams(
            dimension_semantics=("parallel",),
            vmem_limit_bytes=32 * 1024 * 1024),
    )(xpad, params["w1_im2col"], params["bn_bias"], msel, params["phase_mix"], g, itau)


# ----------------------------------------------------------------------------------
# Weighted polyphase downsample: out = sum_p prob[p] * x[:, pi::s, pj::s, :]
# (x is read unsplit; phases are extracted inside the kernel.)
# ----------------------------------------------------------------------------------

def _make_downsample_kernel(s, Ho, Ws, C):
    def kernel(x_ref, prob_ref, out_ref):
        prob = prob_ref[0]                                    # (1, P), read once (hoisted)
        xa = x_ref[0].astype(jnp.float32)                     # (Ho*s, Ws, s*C)
        xr = xa.reshape(Ho, s, Ws, s * C)                     # split H -> (out-row, H-phase)
        acc = jnp.zeros((Ho, Ws, C), jnp.float32)
        for pi in range(s):
            xh = xr[:, pi]                                    # (Ho, Ws, s*C)
            for pj in range(s):                               # W-phase = static lane slice
                acc = acc + xh[:, :, pj * C:(pj + 1) * C] * prob[0, pi * s + pj]
        out_ref[0] = acc.astype(out_ref.dtype)
    return kernel


def lps_weighted_downsample_pallas(x_nhwc, prob_row, *, stride):
    N, H, W, C = x_nhwc.shape
    s = stride
    P = s * s
    assert H % s == 0 and W % s == 0
    Hs, Ws = H // s, W // s
    row_blk = Hs
    for cand in (128, 64, 32, 16, 8):                         # tile output rows -> bigger grid
        if Hs % cand == 0:
            row_blk = cand
            break
    n_rt = Hs // row_blk
    x2 = x_nhwc.reshape(N, H, Ws, s * C)       # free reshape: lane axis packs (W-phase, C)

    return pl.pallas_call(
        _make_downsample_kernel(s, row_blk, Ws, C),
        out_shape=jax.ShapeDtypeStruct((N, Hs, Ws, C), x_nhwc.dtype),
        grid=(N, n_rt),
        in_specs=[
            pl.BlockSpec((1, row_blk * s, Ws, s * C), lambda n, r: (n, r, 0, 0)),
            pl.BlockSpec((1, 1, P), lambda n, r: (n, 0, 0)),
        ],
        out_specs=pl.BlockSpec((1, row_blk, Ws, C), lambda n, r: (n, r, 0, 0)),
        compiler_params=pltpu.CompilerParams(
            dimension_semantics=("parallel", "parallel"),
            vmem_limit_bytes=32 * 1024 * 1024),
    )(x2, prob_row)


# ----------------------------------- LPS module -----------------------------------

def init_lps_params(key, in_channels, hid_channels, stride):
    k1, k2, k3, k4 = jax.random.split(key, 4)
    w1 = jax.random.normal(k1, (hid_channels, in_channels, 3, 3), jnp.float32) \
        * (1.0 / (3.0 * float(in_channels) ** 0.5))
    w2 = jax.random.normal(k2, (1, hid_channels, 3, 3), jnp.float32) \
        * (1.0 / (3.0 * float(hid_channels) ** 0.5))
    gamma = 1.0 + 0.1 * jax.random.normal(k3, (hid_channels,), jnp.float32)
    beta = 0.1 * jax.random.normal(k4, (hid_channels,), jnp.float32)
    running_mean = jnp.zeros((hid_channels,), jnp.float32)
    running_var = jnp.ones((hid_channels,), jnp.float32)
    eps = 1e-5
    # TODO(synk): train-mode BatchNorm batch statistics are not reproduced; eval-form
    # running stats are folded into the conv1 weights / bias.
    bn_scale = gamma / jnp.sqrt(running_var + eps)
    bn_bias = beta - running_mean * bn_scale

    # conv1 -> im2col weight layout (tap-major, then input channel); BN scale folded in.
    w1_im = jnp.transpose(w1, (2, 3, 1, 0)).reshape(9 * in_channels, hid_channels)
    w1_im = w1_im * bn_scale[None, :]

    return {
        "w1_im2col": w1_im.astype(jnp.bfloat16),
        "bn_bias": bn_bias.reshape(1, hid_channels).astype(jnp.float32),
        "phase_mix": _phase_mix_from_w2(w2, stride),          # (P, hid, P) f32
        "gumbel_tau": jnp.float32(1.0),                       # registered buffer tau = 1.0
    }


def lps_forward(params, x_nchw, *, stride, mode="train", prob=None, x_nofilt=None,
                logits_pad="circular", gumbel_key=None, hard=False):
    """Mirrors LPS.forward: returns (out, prob).  NCHW in, NCHW out."""
    N = x_nchw.shape[0]
    s = stride
    P = s * s
    x = jnp.transpose(x_nchw, (0, 2, 3, 1))                   # NHWC
    if prob is None:
        src = x if x_nofilt is None else jnp.transpose(x_nofilt, (0, 2, 3, 1))
        if mode == "train":
            if gumbel_key is None:                            # guard (review concern)
                gumbel_key = jax.random.PRNGKey(0)
            u = jax.random.uniform(gumbel_key, (N, 1, P), jnp.float32,
                                   minval=1e-6, maxval=1.0 - 1e-6)
            g = -jnp.log(-jnp.log(u))
        else:
            g = jnp.zeros((N, 1, P), jnp.float32)
        itau = jnp.reshape(1.0 / params["gumbel_tau"], (1, 1)).astype(jnp.float32)
        prob_row = lps_logit_prob_pallas(params, src, stride=s, mode=mode, hard=hard,
                                         g=g, itau=itau, padding_mode=logits_pad)
    else:
        prob_row = jnp.reshape(prob.astype(jnp.float32), (N, 1, P))
    out_nhwc = lps_weighted_downsample_pallas(x, prob_row, stride=s)
    out = jnp.transpose(out_nhwc, (0, 3, 1, 2))
    return out, jnp.reshape(prob_row, (N, P))


if __name__ == "__main__":
    key = jax.random.PRNGKey(0)
    kx, kp, kg = jax.random.split(key, 3)
    N, Cin, H, W = 2, 4, 16, 16
    hid, stride = 32, 2
    s = stride
    P = s * s
    Hs, Ws = H // s, W // s

    x = jax.random.normal(kx, (N, Cin, H, W), jnp.float32)
    params = init_lps_params(kp, Cin, hid, stride)

    # test mode: hard one-hot phase selection
    out_t, prob_t = lps_forward(params, x, stride=stride, mode="test", logits_pad="circular")
    # train mode: soft gumbel-softmax phase selection with deterministic key
    out_tr, prob_tr = lps_forward(params, x, stride=stride, mode="train",
                                  logits_pad="circular", gumbel_key=kg, hard=False)
    # user-supplied prob path (skips the logit kernel)
    prob_fixed = jnp.tile(jnp.array([[0.25, 0.25, 0.25, 0.25]], jnp.float32), (N, 1))
    out_p, prob_p = lps_forward(params, x, stride=stride, mode="test", prob=prob_fixed)

    jax.block_until_ready((out_t, prob_t, out_tr, prob_tr, out_p, prob_p))

    assert out_t.shape == (N, Cin, Hs, Ws)
    assert prob_t.shape == (N, P)
    assert out_tr.shape == (N, Cin, Hs, Ws)
    assert bool(jnp.all(jnp.abs(jnp.sum(prob_t, axis=1) - 1.0) < 1e-4))
    assert bool(jnp.all(jnp.abs(jnp.sum(prob_tr, axis=1) - 1.0) < 1e-4))
    assert bool(jnp.all(jnp.max(prob_t, axis=1) > 0.999))     # test mode -> one-hot

    # downsample consistency: out == sum_p prob[p] * x[:, :, pi::s, pj::s]
    def ref_downsample(x_nchw, prob):
        acc = jnp.zeros((N, Cin, Hs, Ws), jnp.float32)
        for pi in range(s):
            for pj in range(s):
                w = prob[:, pi * s + pj][:, None, None, None]
                acc = acc + x_nchw[:, :, pi::s, pj::s] * w
        return acc

    assert bool(jnp.max(jnp.abs(out_t - ref_downsample(x, prob_t))) < 1e-5)
    assert bool(jnp.max(jnp.abs(out_tr - ref_downsample(x, prob_tr))) < 1e-5)
    assert bool(jnp.max(jnp.abs(out_p - ref_downsample(x, prob_p))) < 1e-5)
    print("KERNEL_OK")
</pallas_src>

<mosaic_0001>
module attributes {stable_mosaic.version = 11 : i64} {
  func.func @kernel(%arg0: i32, %arg1: memref<1x18x18x4xf32, #tpu.memory_space<vmem>>, %arg2: memref<36x32xbf16, #tpu.memory_space<vmem>>, %arg3: memref<1x32xf32, #tpu.memory_space<vmem>>, %arg4: memref<4x256xf32, #tpu.memory_space<vmem>>, %arg5: memref<4x32x4xf32, #tpu.memory_space<vmem>>, %arg6: memref<1x1x4xf32, #tpu.memory_space<vmem>>, %arg7: memref<1x1xf32, #tpu.memory_space<vmem>>, %arg8: memref<1x1x4xf32, #tpu.memory_space<vmem>>) attributes {dimension_semantics = [#tpu.dimension_semantics<parallel>], iteration_bounds = array<i64: 2>, scalar_prefetch = 0 : i64, scratch_operands = 0 : i64, tpu.core_type = #tpu.core_type<tc>, window_params = [{transform_indices = @transform_0, window_bounds = array<i64: 1, 18, 18, 4>}, {pipeline_mode = #tpu.pipeline_mode<synchronous>, transform_indices = @transform_1, window_bounds = array<i64: 36, 32>}, {pipeline_mode = #tpu.pipeline_mode<synchronous>, transform_indices = @transform_2, window_bounds = array<i64: 1, 32>}, {pipeline_mode = #tpu.pipeline_mode<synchronous>, transform_indices = @transform_3, window_bounds = array<i64: 4, 256>}, {pipeline_mode = #tpu.pipeline_mode<synchronous>, transform_indices = @transform_4, window_bounds = array<i64: 4, 32, 4>}, {transform_indices = @transform_5, window_bounds = array<i64: 1, 1, 4>}, {pipeline_mode = #tpu.pipeline_mode<synchronous>, transform_indices = @transform_6, window_bounds = array<i64: 1, 1>}, {transform_indices = @transform_7, window_bounds = array<i64: 1, 1, 4>}]} {
    %c0 = arith.constant 0 : index
    %c0_0 = arith.constant 0 : index
    %c0_1 = arith.constant 0 : index
    %c0_2 = arith.constant 0 : index
    %0 = vector.load %arg1[%c0, %c0_0, %c0_1, %c0_2] : memref<1x18x18x4xf32, #tpu.memory_space<vmem>>, vector<1x16x16x4xf32>
    %1 = vector.shape_cast %0 : vector<1x16x16x4xf32> to vector<16x16x4xf32>
    %2 = vector.shape_cast %1 : vector<16x16x4xf32> to vector<256x4xf32>
    %c0_3 = arith.constant 0 : index
    %c0_4 = arith.constant 0 : index
    %c1 = arith.constant 1 : index
    %c0_5 = arith.constant 0 : index
    %3 = vector.load %arg1[%c0_3, %c0_4, %c1, %c0_5] : memref<1x18x18x4xf32, #tpu.memory_space<vmem>>, vector<1x16x16x4xf32>
    %4 = vector.shape_cast %3 : vector<1x16x16x4xf32> to vector<16x16x4xf32>
    %5 = vector.shape_cast %4 : vector<16x16x4xf32> to vector<256x4xf32>
    %c0_6 = arith.constant 0 : index
    %c0_7 = arith.constant 0 : index
    %c2 = arith.constant 2 : index
    %c0_8 = arith.constant 0 : index
    %6 = vector.load %arg1[%c0_6, %c0_7, %c2, %c0_8] : memref<1x18x18x4xf32, #tpu.memory_space<vmem>>, vector<1x16x16x4xf32>
    %7 = vector.shape_cast %6 : vector<1x16x16x4xf32> to vector<16x16x4xf32>
    %8 = vector.shape_cast %7 : vector<16x16x4xf32> to vector<256x4xf32>
    %c0_9 = arith.constant 0 : index
    %c1_10 = arith.constant 1 : index
    %c0_11 = arith.constant 0 : index
    %c0_12 = arith.constant 0 : index
    %9 = vector.load %arg1[%c0_9, %c1_10, %c0_11, %c0_12] : memref<1x18x18x4xf32, #tpu.memory_space<vmem>>, vector<1x16x16x4xf32>
    %10 = vector.shape_cast %9 : vector<1x16x16x4xf32> to vector<16x16x4xf32>
    %11 = vector.shape_cast %10 : vector<16x16x4xf32> to vector<256x4xf32>
    %c0_13 = arith.constant 0 : index
    %c1_14 = arith.constant 1 : index
    %c1_15 = arith.constant 1 : index
    %c0_16 = arith.constant 0 : index
    %12 = vector.load %arg1[%c0_13, %c1_14, %c1_15, %c0_16] : memref<1x18x18x4xf32, #tpu.memory_space<vmem>>, vector<1x16x16x4xf32>
    %13 = vector.shape_cast %12 : vector<1x16x16x4xf32> to vector<16x16x4xf32>
    %14 = vector.shape_cast %13 : vector<16x16x4xf32> to vector<256x4xf32>
    %c0_17 = arith.constant 0 : index
    %c1_18 = arith.constant 1 : index
    %c2_19 = arith.constant 2 : index
    %c0_20 = arith.constant 0 : index
    %15 = vector.load %arg1[%c0_17, %c1_18, %c2_19, %c0_20] : memref<1x18x18x4xf32, #tpu.memory_space<vmem>>, vector<1x16x16x4xf32>
    %16 = vector.shape_cast %15 : vector<1x16x16x4xf32> to vector<16x16x4xf32>
    %17 = vector.shape_cast %16 : vector<16x16x4xf32> to vector<256x4xf32>
    %c0_21 = arith.constant 0 : index
    %c2_22 = arith.constant 2 : index
    %c0_23 = arith.constant 0 : index
    %c0_24 = arith.constant 0 : index
    %18 = vector.load %arg1[%c0_21, %c2_22, %c0_23, %c0_24] : memref<1x18x18x4xf32, #tpu.memory_space<vmem>>, vector<1x16x16x4xf32>
    %19 = vector.shape_cast %18 : vector<1x16x16x4xf32> to vector<16x16x4xf32>
    %20 = vector.shape_cast %19 : vector<16x16x4xf32> to vector<256x4xf32>
    %c0_25 = arith.constant 0 : index
    %c2_26 = arith.constant 2 : index
    %c1_27 = arith.constant 1 : index
    %c0_28 = arith.constant 0 : index
    %21 = vector.load %arg1[%c0_25, %c2_26, %c1_27, %c0_28] : memref<1x18x18x4xf32, #tpu.memory_space<vmem>>, vector<1x16x16x4xf32>
    %22 = vector.shape_cast %21 : vector<1x16x16x4xf32> to vector<16x16x4xf32>
    %23 = vector.shape_cast %22 : vector<16x16x4xf32> to vector<256x4xf32>
    %c0_29 = arith.constant 0 : index
    %c2_30 = arith.constant 2 : index
    %c2_31 = arith.constant 2 : index
    %c0_32 = arith.constant 0 : index
    %24 = vector.load %arg1[%c0_29, %c2_30, %c2_31, %c0_32] : memref<1x18x18x4xf32, #tpu.memory_space<vmem>>, vector<1x16x16x4xf32>
    %25 = vector.shape_cast %24 : vector<1x16x16x4xf32> to vector<16x16x4xf32>
    %26 = vector.shape_cast %25 : vector<16x16x4xf32> to vector<256x4xf32>
    %27 = tpu.concatenate %2, %5, %8, %11, %14, %17, %20, %23, %26 in 1 : vector<256x4xf32>, vector<256x4xf32>, vector<256x4xf32>, vector<256x4xf32>, vector<256x4xf32>, vector<256x4xf32>, vector<256x4xf32>, vector<256x4xf32>, vector<256x4xf32> -> vector<256x36xf32>
    %28 = arith.truncf %27 : vector<256x36xf32> to vector<256x36xbf16>
    %c0_33 = arith.constant 0 : index
    %c0_34 = arith.constant 0 : index
    %29 = vector.load %arg2[%c0_33, %c0_34] : memref<36x32xbf16, #tpu.memory_space<vmem>>, vector<36x32xbf16>
    %cst = arith.constant dense<0.000000e+00> : vector<256x32xf32>
    %30 = tpu.matmul %28, %29, %cst {dimension_numbers = #tpu.dot_dimension_numbers<[1], [0], [0], [1], [0, 0, 1, 1], [], []>} : vector<256x36xbf16>, vector<36x32xbf16>, vector<256x32xf32> -> vector<256x32xf32>
    %c0_35 = arith.constant 0 : index
    %c0_36 = arith.constant 0 : index
    %31 = vector.load %arg3[%c0_35, %c0_36] : memref<1x32xf32, #tpu.memory_space<vmem>>, vector<1x32xf32>
    %32 = vector.broadcast %31 : vector<1x32xf32> to vector<256x32xf32>
    %33 = arith.addf %30, %32 : vector<256x32xf32>
    %cst_37 = arith.constant 0.000000e+00 : f32
    %34 = vector.broadcast %cst_37 : f32 to vector<256x32xf32>
    %35 = arith.maximumf %33, %34 : vector<256x32xf32>
    %c0_38 = arith.constant 0 : index
    %c0_39 = arith.constant 0 : index
    %36 = vector.load %arg4[%c0_38, %c0_39] : memref<4x256xf32, #tpu.memory_space<vmem>>, vector<4x256xf32>
    %cst_40 = arith.constant dense<0.000000e+00> : vector<4x32xf32>
    %37 = tpu.matmul %36, %35, %cst_40 {dimension_numbers = #tpu.dot_dimension_numbers<[1], [0], [0], [1], [0, 0, 1, 1], [], []>} : vector<4x256xf32>, vector<256x32xf32>, vector<4x32xf32> -> vector<4x32xf32>
    %cst_41 = arith.constant 0.000000e+00 : f32
    %38 = vector.broadcast %cst_41 : f32 to vector<1x4xf32>
    %39 = vector.extract_strided_slice %37 {offsets = [0, 0], sizes = [1, 32], strides = [1, 1]} : vector<4x32xf32> to vector<1x32xf32>
    %c0_42 = arith.constant 0 : index
    %c0_43 = arith.constant 0 : index
    %c0_44 = arith.constant 0 : index
    %40 = vector.load %arg5[%c0_42, %c0_43, %c0_44] : memref<4x32x4xf32, #tpu.memory_space<vmem>>, vector<1x32x4xf32>
    %41 = vector.shape_cast %40 : vector<1x32x4xf32> to vector<32x4xf32>
    %cst_45 = arith.constant dense<0.000000e+00> : vector<1x4xf32>
    %42 = tpu.matmul %39, %41, %cst_45 {dimension_numbers = #tpu.dot_dimension_numbers<[1], [0], [0], [1], [0, 0, 1, 1], [], []>} : vector<1x32xf32>, vector<32x4xf32>, vector<1x4xf32> -> vector<1x4xf32>
    %43 = arith.addf %38, %42 : vector<1x4xf32>
    %44 = vector.extract_strided_slice %37 {offsets = [1, 0], sizes = [1, 32], strides = [1, 1]} : vector<4x32xf32> to vector<1x32xf32>
    %c1_46 = arith.constant 1 : index
    %c0_47 = arith.constant 0 : index
    %c0_48 = arith.constant 0 : index
    %45 = vector.load %arg5[%c1_46, %c0_47, %c0_48] : memref<4x32x4xf32, #tpu.memory_space<vmem>>, vector<1x32x4xf32>
    %46 = vector.shape_cast %45 : vector<1x32x4xf32> to vector<32x4xf32>
    %cst_49 = arith.constant dense<0.000000e+00> : vector<1x4xf32>
    %47 = tpu.matmul %44, %46, %cst_49 {dimension_numbers = #tpu.dot_dimension_numbers<[1], [0], [0], [1], [0, 0, 1, 1], [], []>} : vector<1x32xf32>, vector<32x4xf32>, vector<1x4xf32> -> vector<1x4xf32>
    %48 = arith.addf %43, %47 : vector<1x4xf32>
    %49 = vector.extract_strided_slice %37 {offsets = [2, 0], sizes = [1, 32], strides = [1, 1]} : vector<4x32xf32> to vector<1x32xf32>
    %c2_50 = arith.constant 2 : index
    %c0_51 = arith.constant 0 : index
    %c0_52 = arith.constant 0 : index
    %50 = vector.load %arg5[%c2_50, %c0_51, %c0_52] : memref<4x32x4xf32, #tpu.memory_space<vmem>>, vector<1x32x4xf32>
    %51 = vector.shape_cast %50 : vector<1x32x4xf32> to vector<32x4xf32>
    %cst_53 = arith.constant dense<0.000000e+00> : vector<1x4xf32>
    %52 = tpu.matmul %49, %51, %cst_53 {dimension_numbers = #tpu.dot_dimension_numbers<[1], [0], [0], [1], [0, 0, 1, 1], [], []>} : vector<1x32xf32>, vector<32x4xf32>, vector<1x4xf32> -> vector<1x4xf32>
    %53 = arith.addf %48, %52 : vector<1x4xf32>
    %54 = vector.extract_strided_slice %37 {offsets = [3, 0], sizes = [1, 32], strides = [1, 1]} : vector<4x32xf32> to vector<1x32xf32>
    %c3 = arith.constant 3 : index
    %c0_54 = arith.constant 0 : index
    %c0_55 = arith.constant 0 : index
    %55 = vector.load %arg5[%c3, %c0_54, %c0_55] : memref<4x32x4xf32, #tpu.memory_space<vmem>>, vector<1x32x4xf32>
    %56 = vector.shape_cast %55 : vector<1x32x4xf32> to vector<32x4xf32>
    %cst_56 = arith.constant dense<0.000000e+00> : vector<1x4xf32>
    %57 = tpu.matmul %54, %56, %cst_56 {dimension_numbers = #tpu.dot_dimension_numbers<[1], [0], [0], [1], [0, 0, 1, 1], [], []>} : vector<1x32xf32>, vector<32x4xf32>, vector<1x4xf32> -> vector<1x4xf32>
    %58 = arith.addf %53, %57 : vector<1x4xf32>
    %cst_57 = arith.constant dense<0xFF800000> : vector<1xf32>
    %59 = vector.multi_reduction <maximumf>, %58, %cst_57 [1] : vector<1x4xf32> to vector<1xf32>
    %60 = vector.shape_cast %59 : vector<1xf32> to vector<1x1xf32>
    %61 = tpu.iota {dimensions = array<i32: 1>} : vector<1x4xi32>
    %62 = vector.broadcast %60 : vector<1x1xf32> to vector<1x4xf32>
    %63 = arith.cmpf oeq, %58, %62 : vector<1x4xf32>
    %c4_i32 = arith.constant 4 : i32
    %64 = vector.broadcast %c4_i32 : i32 to vector<1x4xi32>
    %65 = arith.select %63, %61, %64 : vector<1x4xi1>, vector<1x4xi32>
    %cst_58 = arith.constant dense<2147483647> : vector<1xi32>
    %66 = vector.multi_reduction <minsi>, %65, %cst_58 [1] : vector<1x4xi32> to vector<1xi32>
    %67 = vector.shape_cast %66 : vector<1xi32> to vector<1x1xi32>
    %68 = vector.broadcast %67 : vector<1x1xi32> to vector<1x4xi32>
    %69 = arith.cmpi eq, %61, %68 : vector<1x4xi32>
    %70 = arith.extui %69 : vector<1x4xi1> to vector<1x4xi32>
    %71 = arith.sitofp %70 : vector<1x4xi32> to vector<1x4xf32>
    %c0_59 = arith.constant 0 : index
    %c0_60 = arith.constant 0 : index
    %c0_61 = arith.constant 0 : index
    %72 = vector.load %arg8[%c0_59, %c0_60, %c0_61] : memref<1x1x4xf32, #tpu.memory_space<vmem>>, vector<1x1x4xf32>
    %73 = vector.shape_cast %72 : vector<1x1x4xf32> to vector<1x4xf32>
    %74 = vector.shape_cast %71 : vector<1x4xf32> to vector<1x1x4xf32>
    tpu.vector_store %arg8[%c0_59, %c0_60, %c0_61], %74 {strides = array<i32>} : memref<1x1x4xf32, #tpu.memory_space<vmem>>, vector<1x1x4xf32>,
    return
  }
  func.func @transform_0(%arg0: i32) -> (i32, i32, i32, i32) {
    %c0_i32 = arith.constant 0 : i32
    %c0_i32_0 = arith.constant 0 : i32
    %c0_i32_1 = arith.constant 0 : i32
    %c0_i32_2 = arith.constant 0 : i32
    return %arg0, %c0_i32, %c0_i32_0, %c0_i32_1 : i32, i32, i32, i32
  }
  func.func @transform_1(%arg0: i32) -> (i32, i32) {
    %c0_i32 = arith.constant 0 : i32
    %c0_i32_0 = arith.constant 0 : i32
    %c0_i32_1 = arith.constant 0 : i32
    return %c0_i32, %c0_i32_0 : i32, i32
  }
  func.func @transform_2(%arg0: i32) -> (i32, i32) {
    %c0_i32 = arith.constant 0 : i32
    %c0_i32_0 = arith.constant 0 : i32
    %c0_i32_1 = arith.constant 0 : i32
    return %c0_i32, %c0_i32_0 : i32, i32
  }
  func.func @transform_3(%arg0: i32) -> (i32, i32) {
    %c0_i32 = arith.constant 0 : i32
    %c0_i32_0 = arith.constant 0 : i32
    %c0_i32_1 = arith.constant 0 : i32
    return %c0_i32, %c0_i32_0 : i32, i32
  }
  func.func @transform_4(%arg0: i32) -> (i32, i32, i32) {
    %c0_i32 = arith.constant 0 : i32
    %c0_i32_0 = arith.constant 0 : i32
    %c0_i32_1 = arith.constant 0 : i32
    %c0_i32_2 = arith.constant 0 : i32
    return %c0_i32, %c0_i32_0, %c0_i32_1 : i32, i32, i32
  }
  func.func @transform_5(%arg0: i32) -> (i32, i32, i32) {
    %c0_i32 = arith.constant 0 : i32
    %c0_i32_0 = arith.constant 0 : i32
    %c0_i32_1 = arith.constant 0 : i32
    return %arg0, %c0_i32, %c0_i32_0 : i32, i32, i32
  }
  func.func @transform_6(%arg0: i32) -> (i32, i32) {
    %c0_i32 = arith.constant 0 : i32
    %c0_i32_0 = arith.constant 0 : i32
    %c0_i32_1 = arith.constant 0 : i32
    return %c0_i32, %c0_i32_0 : i32, i32
  }
  func.func @transform_7(%arg0: i32) -> (i32, i32, i32) {
    %c0_i32 = arith.constant 0 : i32
    %c0_i32_0 = arith.constant 0 : i32
    %c0_i32_1 = arith.constant 0 : i32
    return %arg0, %c0_i32, %c0_i32_0 : i32, i32, i32
  }
}

</mosaic_0001>

<bundles_post_ra>
// kernel: tpu_custom_call.1
= control target key start
LH: loop header
LB: loop body
LE: loop exit
PB: predicated region body
PF: predicated region fallthrough
CT: control target
= control target key end

     0   :  { %14 = vsyncpa [#allocation4], 0  ;;  %s5020_s0 = inlined_call_operand.vmem [shape: f32[2,18,18,4], index: 0, kind: input, shape index: {}]   ;;  %s5021_s1 = inlined_call_operand.vmem [shape: bf16[36,32], index: 1, kind: input, shape index: {}]   ;;  %s5022_s2 = inlined_call_operand.vmem [shape: f32[1,32], index: 2, kind: input, shape index: {}]   ;;  %s5023_s3 = inlined_call_operand.vmem [shape: f32[4,256], index: 3, kind: input, shape index: {}]   ;;  %s5024_s4 = inlined_call_operand.vmem [shape: f32[4,32,4], index: 4, kind: input, shape index: {}]   ;;  %s5025_s5 = inlined_call_operand.vmem [shape: f32[2,1,4], index: 5, kind: input, shape index: {}]   ;;  %s5026_s6 = inlined_call_operand.<no memory space> [shape: f32[1,1], index: 6, kind: input, shape index: {}]   ;;  %s5027_s7 = inlined_call_operand.hbm [shape: f32[2,1,4], index: 7, kind: output, shape index: {}]  }
   0x1   :  { %16 = vsyncpa [#allocation4 + $0x1], 0  ;;  %s3920_s24 = smov 0   ;;  %s3922_s25 = smov 0  }
   0x2   :  { %s3924_s26 = smov 0   ;;  %s3926_s27 = smov 0  }
   0x3 LB: > { %s3941_s5 = sadd.s32 4294967295, %s3866_s27   ;;  %s2651_s6 = sadd.s32 4294967294, %s3866_s27   ;;  %s3866_s27 = sphi %s3926_s27, %s5033_s27   ;;  %s3862_s26 = sphi %s3924_s26, %s5032_s26   ;;  %s3858_s25 = sphi %s3922_s25, %s5031_s25   ;;  %s3854_s24 = sphi %s3920_s24, %s5030_s24  }
   0x4   : > { %s3945_s28 = sadd.s32 1, %s3866_s27   ;;  %s186_s29 = sadd.s32 1, %s3862_s26 }
   0x5   : > { %s183_s30 = ssub.s32 %s3866_s27, %s3945_s28  ;;  %p196_p0 = scmp.ne.s32.totalorder %s3862_s26, %s3858_s25 }
   0x6   : > { %p184_p1 = scmp.eq.s32.totalorder %s183_s30, 0  ;;  %p197_p2 = scmp.eq.s32.totalorder %s3941_s5, 1 }
   0x7   : > { %p202_p3 = scmp.ne.s32.totalorder %s3858_s25, %s3854_s24  ;;  %p203_p4 = scmp.eq.s32.totalorder %s2651_s6, 1 }
   0x8   : > { %s3956_s8 = scalar_select %p184_p1, %s3862_s26, %s186_s29  }
   0x9   : > { %p3958_p5 = por %p197_p2, %p196_p0  ;;  %p3962_p6 = por %p203_p4, %p202_p3 }
   0xa   : > { %p2654_p7 = scmp.ge.s32.totalorder %s3866_s27, 1  ;;  %p250_p8 = scmp.lt.s32.totalorder %s3866_s27, 3 }
   0xc   : > { %p251_p9 = pnand %p2654_p7, %p250_p8 }
   0xd   : > { %p284_p10 = scmp.lt.s32.totalorder (!%p251_p9), %s3941_s5, 1  ;;  %s3868_s16 = smov (!%p251_p9), 8   ;;  %v3798_v29 = vld [vmem:[%s5021_s1] sm:$0xff] (!%p251_p9)   ;;  %v3799_v30 = vld [vmem:[%s5021_s1 + $0x8] sm:$0xff] (!%p251_p9)   ;;  %vm1963_vm0 = vcmask (!%p251_p9), 1041408   ;;  %vm1607_vm1 = vcmask (!%p251_p9), 31744  }
   0xe   : > { %254 = sbr.rel (%p251_p9) target bundleno = 1541 (0x605), region = 48  ;;  %s3869_s17 = smov (!%p251_p9), 4   ;;  %2962 = vmatprep.subr.bf16.mxu0 (!%p251_p9), %v3798_v29  ;;  %v3800_v32 = vld [vmem:[%s5021_s1 + $0x10] ss:$0 sps:$4 sm:$0x33] (!%p251_p9)   ;;  %vm1640_vm2 = vcmask (!%p251_p9), 64512  }
   0xf   : > { %s3870_s18 = smov (!%p251_p9), 12   ;;  %s3871_s19 = smov (!%p251_p9), 16   ;;  %2963 = vmatpush3.bf16.msra.mxu0 (!%p251_p9), %v3798_v29  ;;  %v1965_v33 = vsel (!%p251_p9), %vm1963_vm0, %v3800_v32, 0  ;;  %vm1673_vm3 = vcmask (!%p251_p9), 97280   ;;  %vm1706_vm4 = vcmask (!%p251_p9), 130048   ;;  %vm1739_vm5 = vcmask (!%p251_p9), 162816  }
  0x10   : > { %s3872_s20 = smov (!%p251_p9), 20   ;;  %s3873_s29 = smov (!%p251_p9), 24   ;;  %2964 = vmatprep.subr.bf16.mxu0 (!%p251_p9), %v3799_v30  ;;  %vm1772_vm6 = vcmask (!%p251_p9), 195584   ;;  %vm1805_vm7 = vcmask (!%p251_p9), 228352   ;;  %vm1838_vm8 = vcmask (!%p251_p9), 261120   ;;  %vm1914_vm9 = vcmask (!%p251_p9), 293888  }
  0x11   : > { %s3875_s13 = smov (!%p251_p9), 32   ;;  %vm3877_vm10 = vmmov (!%p251_p9), 0   ;;  %vm2547_vm11 = vcmask (!%p251_p9), 24576   ;;  %s3879_s30 = smov (!%p251_p9), [#allocation3]  }
  0x13   : > { %2965 = vmatpush3.bf16.msra.mxu0 (!%p251_p9), %v3799_v30 }
  0x14   : > { %3106 = vmatprep.subr.msk.bf16.mxu0 (!%p251_p9), %vm1963_vm0, %v3800_v32 }
  0x15   : > { %s285_s11 = scalar_select %p284_p10, %s3941_s5, 1 }
  0x17   : > { %s3107_s12 = smul.u32 432, %s285_s11  ;;  %2967 = vmatpush3.bf16.msra.mxu0 %v1965_v33  ;;  %s3808_s11 = sshll.u32 %s3879_s30, 4  ;;  %s3809_s11 = int_to_ptr.vmem [resolvable:$false] %s3808_s11 }
  0x19   : > { %s3973_s15 = scalar_lea.vmem %s5020_s0, %s3107_s12  ;;  %s3874_s12 = smov 28  }
  0x1a   : > { %v357_v0 = vld [vmem:[%s3973_s15 + $0x2] sm:$0xff]  ;;  %v358_v1 = vld [vmem:[%s3973_s15 + $0xa] sm:$0xff]  ;;  %v359_v5 = vld [vmem:[%s3973_s15 + $0x1a] sm:$0xff] }
  0x1b   : > { %v325_v2 = vld [vmem:[%s3973_s15 + $0x1] sm:$0xff]  ;;  %v3168_v3 = vpack.i.bf16 %v358_v1, %v357_v0  ;;  %v326_v4 = vld [vmem:[%s3973_s15 + $0x9] sm:$0xff]  ;;  %v327_v8 = vld [vmem:[%s3973_s15 + $0x19] sm:$0xff] }
  0x1c   : > { %v360_v6 = vld [vmem:[%s3973_s15 + $0x22] sm:$0xff]  ;;  %v3158_v7 = vpack.i.bf16 %v326_v4, %v325_v2  ;;  %v3986_v12 = vld [vmem:[%s3973_s15 + $0x30] sm:$0xff]  ;;  %v3989_v13 = vld [vmem:[%s3973_s15 + $0x38] sm:$0xff] }
  0x1d   : > { %v328_v9 = vld [vmem:[%s3973_s15 + $0x21] sm:$0xff]  ;;  %3169 = vrot.lane.b32.xlu1 %v3168_v3, %s3868_s16  ;;  %v3173_v10 = vpack.i.bf16 %v360_v6, %v359_v5  ;;  %v3992_v14 = vld [vmem:[%s3973_s15 + $0x18] sm:$0xff]  ;;  %v3183_v16 = vpack.i.bf16 %v3989_v13, %v3986_v12  ;;  %v4015_v25 = vld [vmem:[%s3973_s15 + $0x50] sm:$0xff] }
  0x1e   : > { %3159 = vrot.lane.b32.xlu0 %v3158_v7, %s3869_s17  ;;  %v3163_v11 = vpack.i.bf16 %v328_v9, %v327_v8  ;;  %v3995_v15 = vld [vmem:[%s3973_s15 + $0x20] sm:$0xff]  ;;  %v2690_v18 = vld [vmem:[%s3973_s15 + $0x31] sm:$0xff]  ;;  %v4012_v24 = vld [vmem:[%s3973_s15 + $0x48] sm:$0xff] }
  0x1f   : > { %v3178_v17 = vpack.i.bf16 %v3995_v15, %v3992_v14  ;;  %v2691_v19 = vld [vmem:[%s3973_s15 + $0x39] sm:$0xff]  ;;  %v3213_v26 = vpack.i.bf16 %v4015_v25, %v4012_v24  ;;  %v2786_v27 = vld [vmem:[%s3973_s15 + $0x49] sm:$0xff]  ;;  %v2787_v28 = vld [vmem:[%s3973_s15 + $0x51] sm:$0xff] }
  0x20   : > { %v3193_v20 = vpack.i.bf16 %v2691_v19, %v2690_v18  ;;  %v2722_v21 = vld [vmem:[%s3973_s15 + $0x32] sm:$0xff]  ;;  %v2723_v22 = vld [vmem:[%s3973_s15 + $0x3a] sm:$0xff]  ;;  %v3223_v31 = vpack.i.bf16 %v2787_v28, %v2786_v27  ;;  %v2818_v34 = vld [vmem:[%s3973_s15 + $0x4a] sm:$0xff] }
  0x21   : > { %3174 = vrot.lane.b32.xlu1 %v3173_v10, %s3868_s16  ;;  %v3203_v23 = vpack.i.bf16 %v2723_v22, %v2722_v21  ;;  %v2819_v35 = vld [vmem:[%s3973_s15 + $0x52] sm:$0xff]  ;;  %v4043_v37 = vld [vmem:[%s3973_s15 + $0x60] sm:$0xff]  ;;  %v4046_v38 = vld [vmem:[%s3973_s15 + $0x68] sm:$0xff] }
  0x22   : > { %3164 = vrot.lane.b32.xlu0 %v3163_v11, %s3869_s17  ;;  %v3238_v36 = vpack.i.bf16 %v2819_v35, %v2818_v34  ;;  %v3263_v39 = vpack.i.bf16 %v4046_v38, %v4043_v37  ;;  %v2694_v40 = vld [vmem:[%s3973_s15 + $0x61] sm:$0xff]  ;;  %v2695_v41 = vld [vmem:[%s3973_s15 + $0x69] sm:$0xff]  ;;  %v4061_v46 = vld [vmem:[%s3973_s15 + $0x78] sm:$0xff] }
  0x23   : > { %v3273_v42 = vpack.i.bf16 %v2695_v41, %v2694_v40  ;;  %v2726_v43 = vld [vmem:[%s3973_s15 + $0x62] sm:$0xff]  ;;  %v2727_v44 = vld [vmem:[%s3973_s15 + $0x6a] sm:$0xff]  ;;  %v2790_v49 = vld [vmem:[%s3973_s15 + $0x79] sm:$0xff] }
  0x24   : > { %v3283_v45 = vpack.i.bf16 %v2727_v44, %v2726_v43  ;;  %v4064_v47 = vld [vmem:[%s3973_s15 + $0x80] sm:$0xff]  ;;  %v2666_v55 = vld [vmem:[%s3973_s15 + $0x90] sm:$0xff]  ;;  %v2667_v56 = vld [vmem:[%s3973_s15 + $0x98] sm:$0xff] }
  0x25   : > { %3184 = vrot.lane.b32.xlu1 %v3183_v16, %s3870_s18  ;;  %v3293_v48 = vpack.i.bf16 %v4064_v47, %v4061_v46  ;;  %v2791_v50 = vld [vmem:[%s3973_s15 + $0x81] sm:$0xff]  ;;  %v3343_v57 = vpack.i.bf16 %v2667_v56, %v2666_v55  ;;  %v2698_v58 = vld [vmem:[%s3973_s15 + $0x91] sm:$0xff]  ;;  %v2699_v59 = vld [vmem:[%s3973_s15 + $0x99] sm:$0xff] }
  0x26   : > { %3179 = vrot.lane.b32.xlu0 %v3178_v17, %s3870_s18  ;;  %v3303_v51 = vpack.i.bf16 %v2791_v50, %v2790_v49  ;;  %v2822_v52 = vld [vmem:[%s3973_s15 + $0x7a] sm:$0xff]  ;;  %v2823_v53 = vld [vmem:[%s3973_s15 + $0x82] sm:$0xff]  ;;  %v3353_v60 = vpack.i.bf16 %v2699_v59, %v2698_v58  ;;  %v2730_v61 = vld [vmem:[%s3973_s15 + $0x92] sm:$0xff] }
  0x27   : > { %v3318_v54 = vpack.i.bf16 %v2823_v53, %v2822_v52  ;;  %v2731_v62 = vld [vmem:[%s3973_s15 + $0x9a] sm:$0xff]  ;;  %v2762_v0 = vld [vmem:[%s3973_s15 + $0xa8] sm:$0xff]  ;;  %v2763_v1 = vld [vmem:[%s3973_s15 + $0xb0] sm:$0xff] }
  0x28   : > { %v3363_v63 = vpack.i.bf16 %v2731_v62, %v2730_v61  ;;  %v3373_v2 = vpack.i.bf16 %v2763_v1, %v2762_v0  ;;  %v2794_v3 = vld [vmem:[%s3973_s15 + $0xa9] sm:$0xff]  ;;  %v2795_v4 = vld [vmem:[%s3973_s15 + $0xb1] sm:$0xff]  ;;  %v2670_v9 = vld [vmem:[%s3973_s15 + $0xc0] sm:$0xff] }
  0x29   : > { %3194 = vrot.lane.b32.xlu1 %v3193_v20, %s3871_s19  ;;  %v3383_v5 = vpack.i.bf16 %v2795_v4, %v2794_v3  ;;  %v2826_v6 = vld [vmem:[%s3973_s15 + $0xaa] sm:$0xff]  ;;  %v2827_v7 = vld [vmem:[%s3973_s15 + $0xb2] sm:$0xff]  ;;  %v2734_v19 = vld [vmem:[%s3973_s15 + $0xc2] sm:$0xff] }
  0x2a   : > { %3189 = vrot.lane.b32.xlu0 %v3163_v11, %s3871_s19  ;;  %v3398_v8 = vpack.i.bf16 %v2827_v7, %v2826_v6  ;;  %v2703_v17 = vld [vmem:[%s3973_s15 + $0xc9] sm:$0xff]  ;;  %v2766_v22 = vld [vmem:[%s3973_s15 + $0xd8] sm:$0xff]  ;;  %v2799_v28 = vld [vmem:[%s3973_s15 + $0xe1] sm:$0xff] }
  0x2b   : > { %v2798_v27 = vld [vmem:[%s3973_s15 + $0xd9] sm:$0xff]  ;;  %v2674_v43 = vld [vmem:[%s3973_s15 + $0xf0] sm:$0xff]  ;;  %v2770_v3 = vld [vmem:[%s3973_s15 + $0x108] sm:$0xff] }
  0x2c   : > { %v2830_v35 = vld [vmem:[%s3973_s15 + $0xda] sm:$0xff]  ;;  %v2706_v58 = vld [vmem:[%s3973_s15 + $0xf1] sm:$0xff] }
  0x2d   : > { %3204 = vrot.lane.b32.xlu1 %v3203_v23, %s3872_s20  ;;  %v2675_v44 = vld [vmem:[%s3973_s15 + $0xf8] sm:$0xff]  ;;  %v293_v50 = vld [vmem:[%s3973_s15] sm:$0xff]  ;;  %v2771_v4 = vld [vmem:[%s3973_s15 + $0x110] sm:$0xff] }
  0x2e   : > { %3199 = vrot.lane.b32.xlu0 %v3173_v10, %s3872_s20  ;;  %v2671_v10 = vld [vmem:[%s3973_s15 + $0xc8] sm:$0xff]  ;;  %v4170_v55 = vpack.i.bf16 %v2675_v44, %v2674_v43  ;;  %v2707_v59 = vld [vmem:[%s3973_s15 + $0xf9] sm:$0xff] }
  0x2f   : > { %v3423_v11 = vpack.i.bf16 %v2671_v10, %v2670_v9 }
  0x31   : > { %3214 = vrot.lane.b32.xlu1 %v3213_v26, %s3873_s29 }
  0x32   : > { %3209 = vrot.lane.b32.xlu0 %v3183_v16, %s3873_s29  ;;  %v2702_v16 = vld [vmem:[%s3973_s15 + $0xc1] sm:$0xff] }
  0x33   : > { %v3433_v18 = vpack.i.bf16 %v2703_v17, %v2702_v16  ;;  %v4197_v16 = vpack.i.bf16 %v2707_v59, %v2706_v58  ;;  %v2802_v59 = vld [vmem:[%s3973_s15 + $0x109] sm:$0xff] }
  0x35   : > { %3224 = vrot.lane.b32.xlu1 %v3223_v31, %s3874_s12 }
  0x36   : > { %3219 = vrot.lane.b32.xlu0 %v3193_v20, %s3874_s12 }
  0x39   : > { %3234 = vrot.lane.b32.xlu1 %v3193_v20, %s3869_s17  ;;  %v2735_v20 = vld [vmem:[%s3973_s15 + $0xca] sm:$0xff] }
  0x3a   : > { %3229 = vrot.lane.b32.xlu0 %v3203_v23, %s3875_s13  ;;  %v3443_v21 = vpack.i.bf16 %v2735_v20, %v2734_v19 }
  0x3d   : > { %3244 = vrot.lane.b32.xlu1 %v3223_v31, %s3869_s17 }
  0x3e   : > { %3239 = vrot.lane.b32.xlu0 %v3238_v36, %s3875_s13 }
  0x41   : > { %3254 = vrot.lane.b32.xlu1 %v3238_v36, %s3868_s16 }
  0x42   : > { %3249 = vrot.lane.b32.xlu0 %v3203_v23, %s3868_s16  ;;  %v2767_v23 = vld [vmem:[%s3973_s15 + $0xe0] sm:$0xff] }
  0x45   : > { %3264 = vrot.lane.b32.xlu1 %v3263_v39, %s3870_s18 }
  0x46   : > { %3259 = vrot.lane.b32.xlu0 %v3213_v26, %s3870_s18  ;;  %v4125_v26 = vpack.i.bf16 %v2767_v23, %v2766_v22 }
  0x49   : > { %3274 = vrot.lane.b32.xlu1 %v3273_v42, %s3871_s19 }
  0x4a   : > { %3269 = vrot.lane.b32.xlu0 %v3223_v31, %s3871_s19  ;;  %v4134_v31 = vpack.i.bf16 %v2799_v28, %v2798_v27 }
  0x4d   : > { %3284 = vrot.lane.b32.xlu1 %v3283_v45, %s3872_s20 }
  0x4e   : > { %3279 = vrot.lane.b32.xlu0 %v3238_v36, %s3872_s20  ;;  %v2831_v36 = vld [vmem:[%s3973_s15 + $0xe2] sm:$0xff] }
  0x4f   : > { %v4150_v40 = vpack.i.bf16 %v2831_v36, %v2830_v35 }
  0x51   : > { %3294 = vrot.lane.b32.xlu1 %v3293_v48, %s3873_s29 }
  0x52   : > { %3289 = vrot.lane.b32.xlu0 %v3263_v39, %s3873_s29 }
  0x55   : > { %3304 = vrot.lane.b32.xlu1 %v3303_v51, %s3874_s12 }
  0x56   : > { %3299 = vrot.lane.b32.xlu0 %v3273_v42, %s3874_s12 }
  0x59   : > { %3314 = vrot.lane.b32.xlu1 %v3273_v42, %s3869_s17 }
  0x5a   : > { %3309 = vrot.lane.b32.xlu0 %v3283_v45, %s3875_s13 }
  0x5d   : > { %3324 = vrot.lane.b32.xlu1 %v3303_v51, %s3869_s17 }
  0x5e   : > { %3319 = vrot.lane.b32.xlu0 %v3318_v54, %s3875_s13 }
  0x61   : > { %3334 = vrot.lane.b32.xlu1 %v3318_v54, %s3868_s16 }
  0x62   : > { %3329 = vrot.lane.b32.xlu0 %v3283_v45, %s3868_s16 }
  0x65   : > { %3344 = vrot.lane.b32.xlu1 %v3343_v57, %s3870_s18 }
  0x66   : > { %3339 = vrot.lane.b32.xlu0 %v3293_v48, %s3870_s18 }
  0x69   : > { %3354 = vrot.lane.b32.xlu1 %v3353_v60, %s3871_s19 }
  0x6a   : > { %3349 = vrot.lane.b32.xlu0 %v3303_v51, %s3871_s19  ;;  %v294_v51 = vld [vmem:[%s3973_s15 + $0x8] sm:$0xff] }
  0x6d   : > { %3364 = vrot.lane.b32.xlu1 %v3363_v63, %s3872_s20 }
  0x6e   : > { %3359 = vrot.lane.b32.xlu0 %v3318_v54, %s3872_s20 }
  0x71   : > { %3374 = vrot.lane.b32.xlu1 %v3373_v2, %s3873_s29 }
  0x72   : > { %3369 = vrot.lane.b32.xlu0 %v3343_v57, %s3873_s29 }
  0x75   : > { %3384 = vrot.lane.b32.xlu1 %v3383_v5, %s3874_s12 }
  0x76   : > { %3379 = vrot.lane.b32.xlu0 %v3353_v60, %s3874_s12 }
  0x79   : > { %3394 = vrot.lane.b32.xlu1 %v3353_v60, %s3869_s17  ;;  %v2738_v60 = vld [vmem:[%s3973_s15 + $0xf2] sm:$0xff] }
  0x7a   : > { %3389 = vrot.lane.b32.xlu0 %v3363_v63, %s3875_s13 }
  0x7d   : > { %3404 = vrot.lane.b32.xlu1 %v3383_v5, %s3869_s17 }
  0x7e   : > { %3399 = vrot.lane.b32.xlu0 %v3398_v8, %s3875_s13 }
  0x81   : > { %3414 = vrot.lane.b32.xlu1 %v3398_v8, %s3868_s16 }
  0x82   : > { %3409 = vrot.lane.b32.xlu0 %v3363_v63, %s3868_s16 }
  0x85   : > { %3424 = vrot.lane.b32.xlu1 %v3423_v11, %s3870_s18 }
  0x86   : > { %3419 = vrot.lane.b32.xlu0 %v3373_v2, %s3870_s18  ;;  %v2739_v2 = vld [vmem:[%s3973_s15 + $0xfa] sm:$0xff] }
  0x89   : > { %3434 = vrot.lane.b32.xlu1 %v3433_v18, %s3871_s19 }
  0x8a   : > { %3429 = vrot.lane.b32.xlu0 %v3383_v5, %s3871_s19 }
  0x8d   : > { %3444 = vrot.lane.b32.xlu1 %v3443_v21, %s3872_s20 }
  0x8e   : > { %3439 = vrot.lane.b32.xlu0 %v3398_v8, %s3872_s20 }
  0x8f   : > { %v4130_v29 = vpop.permute.xlu1 %3169 }
  0x90   : > { %v3160_v30 = vpop.permute.xlu0 %3159  ;;  %v3172_v56 = vunpack.i.h.bf16 %v4130_v29  ;;  %v3171_v57 = vunpack.i.l.bf16 %v4130_v29 }
  0x91   : > { %3454 = vrot.lane.b32.xlu1 %v4125_v26, %s3873_s29  ;;  %v3162_v45 = vunpack.i.h.bf16 %v3160_v30  ;;  %v3161_v48 = vunpack.i.l.bf16 %v3160_v30 }
  0x92   : > { %3449 = vrot.lane.b32.xlu0 %v3423_v11, %s3873_s29 }
  0x93   : > { %v4137_v32 = vpop.permute.xlu1 %3174  ;;  %v1608_v61 = vsel %vm1607_vm1, %v293_v50, %v3161_v48  ;;  %v1609_v62 = vsel %vm1607_vm1, %v294_v51, %v3162_v45 }
  0x94   : > { %v3165_v33 = vpop.permute.xlu0 %3164  ;;  %v3177_v63 = vunpack.i.h.bf16 %v4137_v32  ;;  %v3176_v0 = vunpack.i.l.bf16 %v4137_v32  ;;  %v1642_v17 = vsel %vm1640_vm2, %v1609_v62, %v3172_v56 }
  0x95   : > { %3464 = vrot.lane.b32.xlu1 %v4134_v31, %s3874_s12  ;;  %v3167_v52 = vunpack.i.h.bf16 %v3165_v33  ;;  %v3166_v53 = vunpack.i.l.bf16 %v3165_v33 }
  0x96   : > { %3459 = vrot.lane.b32.xlu0 %v3433_v18, %s3874_s12 }
  0x97   : > { %v4142_v34 = vpop.permute.xlu1 %3184  ;;  %v1610_v5 = vsel %vm1607_vm1, %v3992_v14, %v3166_v53  ;;  %v1611_v6 = vsel %vm1607_vm1, %v3995_v15, %v3167_v52  ;;  %v1641_v14 = vsel %vm1640_vm2, %v1608_v61, %v3171_v57  ;;  %v4203_v15 = vpack.i.bf16 %v2739_v2, %v2738_v60  ;;  %v2803_v60 = vld [vmem:[%s3973_s15 + $0x111] sm:$0xff] }
  0x98   : > { %v4146_v39 = vpop.permute.xlu0 %3179  ;;  %v3187_v7 = vunpack.i.h.bf16 %v4142_v34  ;;  %v3186_v8 = vunpack.i.l.bf16 %v4142_v34  ;;  %v1643_v19 = vsel %vm1640_vm2, %v1610_v5, %v3176_v0  ;;  %v1644_v20 = vsel %vm1640_vm2, %v1611_v6, %v3177_v63 }
  0x99   : > { %3474 = vrot.lane.b32.xlu1 %v3433_v18, %s3869_s17  ;;  %v3182_v10 = vunpack.i.h.bf16 %v4146_v39  ;;  %v3181_v11 = vunpack.i.l.bf16 %v4146_v39  ;;  %v4205_v18 = vpack.i.bf16 %v2771_v4, %v2770_v3 }
  0x9a   : > { %3469 = vrot.lane.b32.xlu0 %v3443_v21, %s3875_s13  ;;  %v1676_v27 = vsel %vm1673_vm3, %v1643_v19, %v3186_v8  ;;  %v1677_v28 = vsel %vm1673_vm3, %v1644_v20, %v3187_v7 }
  0x9b   : > { %v4152_v41 = vpop.permute.xlu1 %3194  ;;  %v1674_v32 = vsel %vm1673_vm3, %v1641_v14, %v3181_v11  ;;  %v1675_v33 = vsel %vm1673_vm3, %v1642_v17, %v3182_v10 }
  0x9c   : > { %v4154_v42 = vpop.permute.xlu0 %3189  ;;  %v3197_v36 = vunpack.i.h.bf16 %v4152_v41  ;;  %v3196_v39 = vunpack.i.l.bf16 %v4152_v41 }
  0x9d   : > { %3484 = vrot.lane.b32.xlu1 %v4134_v31, %s3869_s17  ;;  %v3191_v22 = vunpack.i.l.bf16 %v4154_v42 }
  0x9e   : > { %3479 = vrot.lane.b32.xlu0 %v4150_v40, %s3875_s13  ;;  %v1710_v2 = vsel %vm1706_vm4, %v1677_v28, %v3197_v36 }
  0x9f   : > { %v4162_v49 = vpop.permute.xlu1 %3204  ;;  %v1707_v44 = vsel %vm1706_vm4, %v1674_v32, %v3191_v22 }
  0xa0   : > { %v4166_v54 = vpop.permute.xlu0 %3199  ;;  %v3207_v48 = vunpack.i.h.bf16 %v4162_v49  ;;  %v3206_v50 = vunpack.i.l.bf16 %v4162_v49 }
  0xa1   : > { %3494 = vrot.lane.b32.xlu1 %v4150_v40, %s3868_s16  ;;  %v3201_v29 = vunpack.i.l.bf16 %v4166_v54 }
  0xa2   : > { %3489 = vrot.lane.b32.xlu0 %v3443_v21, %s3868_s16  ;;  %v3192_v21 = vunpack.i.h.bf16 %v4154_v42  ;;  %v1743_v7 = vsel %vm1739_vm5, %v1710_v2, %v3207_v48 }
  0xa3   : > { %v4182_v1 = vpop.permute.xlu1 %3214  ;;  %v1740_v52 = vsel %vm1739_vm5, %v1707_v44, %v3201_v29  ;;  %v2835_v29 = vld [vmem:[%s3973_s15 + $0x112] sm:$0xff]  ;;  %v2742_v44 = vld [vmem:[%s3973_s15 + $0x122] sm:$0xff] }
  0xa4   : > { %v3210_v9 = vpop.permute.xlu0 %3209  ;;  %v1708_v45 = vsel %vm1706_vm4, %v1675_v33, %v3192_v21  ;;  %v3217_v53 = vunpack.i.h.bf16 %v4182_v1 }
  0xa5   : > { %3504 = vrot.lane.b32.xlu1 %v4170_v55, %s3870_s18  ;;  %v3212_v34 = vunpack.i.h.bf16 %v3210_v9  ;;  %v3211_v35 = vunpack.i.l.bf16 %v3210_v9  ;;  %v4251_v9 = vpack.i.bf16 %v2803_v60, %v2802_v59 }
  0xa6   : > { %3499 = vrot.lane.b32.xlu0 %v4125_v26, %s3870_s18  ;;  %v3202_v26 = vunpack.i.h.bf16 %v4166_v54  ;;  %v1776_v11 = vsel %vm1772_vm6, %v1743_v7, %v3217_v53  ;;  %v2775_v53 = vld [vmem:[%s3973_s15 + $0x140] sm:$0xff] }
  0xa7   : > { %v3225_v23 = vpop.permute.xlu1 %3224  ;;  %v1773_v58 = vsel %vm1772_vm6, %v1740_v52, %v3211_v35  ;;  %v2678_v35 = vld [vmem:[%s3973_s15 + $0x120] sm:$0xff]  ;;  %v2743_v52 = vld [vmem:[%s3973_s15 + $0x12a] sm:$0xff] }
  0xa8   : > { %v3220_v30 = vpop.permute.xlu0 %3219  ;;  %v1741_v41 = vsel %vm1739_vm5, %v1708_v45, %v3202_v26  ;;  %v3227_v61 = vunpack.i.h.bf16 %v3225_v23  ;;  %v3226_v62 = vunpack.i.l.bf16 %v3225_v23  ;;  %v2834_v26 = vld [vmem:[%s3973_s15 + $0x10a] sm:$0xff] }
  0xa9   : > { %3514 = vrot.lane.b32.xlu1 %v4197_v16, %s3871_s19  ;;  %v3222_v42 = vunpack.i.h.bf16 %v3220_v30  ;;  %v3221_v43 = vunpack.i.l.bf16 %v3220_v30  ;;  %v1774_v49 = vsel %vm1772_vm6, %v1741_v41, %v3212_v34  ;;  %v4275_v32 = vpack.i.bf16 %v2835_v29, %v2834_v26  ;;  %v2774_v41 = vld [vmem:[%s3973_s15 + $0x138] sm:$0xff] }
  0xaa   : > { %3509 = vrot.lane.b32.xlu0 %v4134_v31, %s3871_s19  ;;  %v3216_v31 = vunpack.i.l.bf16 %v4182_v1  ;;  %v1709_v1 = vsel %vm1706_vm4, %v1676_v27, %v3196_v39  ;;  %v1809_v20 = vsel %vm1805_vm7, %v1776_v11, %v3227_v61 }
  0xab   : > { %v4227_v51 = vpop.permute.xlu1 %3234  ;;  %v1806_v63 = vsel %vm1805_vm7, %v1773_v58, %v3221_v43  ;;  %v1807_v0 = vsel %vm1805_vm7, %v1774_v49, %v3222_v42  ;;  %v1742_v6 = vsel %vm1739_vm5, %v1709_v1, %v3206_v50  ;;  %v2710_v42 = vld [vmem:[%s3973_s15 + $0x121] sm:$0xff]  ;;  %v2711_v43 = vld [vmem:[%s3973_s15 + $0x129] sm:$0xff]  ;;  %v4313_v1 = vpack.i.bf16 %v2775_v53, %v2774_v41 }
  0xac   : > { %v3230_v54 = vpop.permute.xlu0 %3229  ;;  %v1775_v10 = vsel %vm1772_vm6, %v1742_v6, %v3216_v31  ;;  %v3237_v31 = vunpack.i.h.bf16 %v4227_v51  ;;  %v4309_v60 = vpack.i.bf16 %v2711_v43, %v2710_v42 }
  0xad   : > { %v3232_v56 = vunpack.i.h.bf16 %v3230_v54  ;;  %v3231_v57 = vunpack.i.l.bf16 %v3230_v54  ;;  %3524 = vrot.lane.b32.xlu1 %v4203_v15, %s3872_s20  ;;  %v1808_v19 = vsel %vm1805_vm7, %v1775_v10, %v3226_v62  ;;  %v3236_v54 = vunpack.i.l.bf16 %v4227_v51 }
  0xae   : > { %3519 = vrot.lane.b32.xlu0 %v4150_v40, %s3872_s20 }
  0xaf   : > { %v4245_v3 = vpop.permute.xlu1 %3244  ;;  %v1839_v4 = vsel %vm1838_vm8, %v1806_v63, %v3231_v57  ;;  %v1840_v5 = vsel %vm1838_vm8, %v1807_v0, %v3232_v56  ;;  %v4311_v0 = vpack.i.bf16 %v2743_v52, %v2742_v44 }
  0xb0   : > { %v3240_v8 = vpop.permute.xlu0 %3239  ;;  %v1871_v40 = vpack.c.bf16 %v1840_v5, %v1839_v4  ;;  %v3247_v45 = vunpack.i.h.bf16 %v4245_v3  ;;  %v3246_v48 = vunpack.i.l.bf16 %v4245_v3  ;;  %v1612_v4 = vsel %vm1607_vm1, %v3986_v12, %v3236_v54 }
  0xb1   : > { %v3242_v14 = vunpack.i.h.bf16 %v3240_v8  ;;  %v3241_v17 = vunpack.i.l.bf16 %v3240_v8  ;;  %3534 = vrot.lane.b32.xlu1 %v4205_v18, %s3873_s29  ;;  %v1613_v5 = vsel %vm1607_vm1, %v3989_v13, %v3237_v31 }
  0xb2   : > { %3529 = vrot.lane.b32.xlu0 %v4170_v55, %s3873_s29  ;;  %2968 = vmatprep.mubr.msk.bf16.mxu0 %vm1914_vm9, %v1871_v40  ;;  %v1614_v51 = vsel %vm1607_vm1, %v4012_v24, %v3246_v48  ;;  %v1615_v2 = vsel %vm1607_vm1, %v4015_v25, %v3247_v45  ;;  %v2807_v48 = vld [vmem:[%s3973_s15 + $0x141] sm:$0xff] }
  0xb3   : > { %v1841_v21 = vsel %vm1838_vm8, %v1808_v19, %v3241_v17  ;;  %v1842_v22 = vsel %vm1838_vm8, %v1809_v20, %v3242_v14  ;;  %v3255_v23 = vpop.permute.xlu1 %3254 }
  0xb4   : > { %v3250_v27 = vpop.permute.xlu0 %3249  ;;  %v1872_v28 = vpack.c.bf16 %v1842_v22, %v1841_v21  ;;  %v3257_v56 = vunpack.i.h.bf16 %v3255_v23  ;;  %v3256_v57 = vunpack.i.l.bf16 %v3255_v23 }
  0xb5   : > { %3544 = vrot.lane.b32.xlu1 %v4251_v9, %s3874_s12  ;;  %v3252_v58 = vunpack.i.h.bf16 %v3250_v27  ;;  %v3251_v49 = vunpack.i.l.bf16 %v3250_v27 }
  0xb6   : > { %3539 = vrot.lane.b32.xlu0 %v4197_v16, %s3874_s12  ;;  %2969 = vmatmul.mubr.msk.bf16.vlgmr.msra.gmra.mrb[0].mxu0 %vm1914_vm9, %v1872_v28  ;;  %v1647_v6 = vsel %vm1640_vm2, %v1614_v51, %v3256_v57  ;;  %v1648_v7 = vsel %vm1640_vm2, %v1615_v2, %v3257_v56 }
  0xb7   : > { %v3265_v55 = vpop.permute.xlu1 %3264  ;;  %v1645_v24 = vsel %vm1640_vm2, %v1612_v4, %v3251_v49  ;;  %v1646_v25 = vsel %vm1640_vm2, %v1613_v5, %v3252_v58 }
  0xb8   : > { %v3260_v30 = vpop.permute.xlu0 %3259  ;;  %v3267_v61 = vunpack.i.h.bf16 %v3265_v55  ;;  %v3266_v62 = vunpack.i.l.bf16 %v3265_v55 }
  0xb9   : > { %3554 = vrot.lane.b32.xlu1 %v4197_v16, %s3869_s17  ;;  %v2679_v16 = vld [vmem:[%s3973_s15 + $0x128] sm:$0xff]  ;;  %v3261_v3 = vunpack.i.l.bf16 %v3260_v30 }
  0xba   : > { %3549 = vrot.lane.b32.xlu0 %v4203_v15, %s3875_s13  ;;  %v4298_v50 = vpack.i.bf16 %v2679_v16, %v2678_v35  ;;  %v1680_v12 = vsel %vm1673_vm3, %v1647_v6, %v3266_v62  ;;  %v1681_v13 = vsel %vm1673_vm3, %v1648_v7, %v3267_v61 }
  0xbb   : > { %v4277_v33 = vpop.permute.xlu1 %3274 }
  0xbc   : > { %v4279_v34 = vpop.permute.xlu0 %3269  ;;  %v3277_v22 = vunpack.i.h.bf16 %v4277_v33  ;;  %v3276_v23 = vunpack.i.l.bf16 %v4277_v33 }
  0xbd   : > { %3564 = vrot.lane.b32.xlu1 %v4251_v9, %s3869_s17  ;;  %v3272_v8 = vunpack.i.h.bf16 %v4279_v34  ;;  %v3271_v40 = vunpack.i.l.bf16 %v4279_v34 }
  0xbe   : > { %3559 = vrot.lane.b32.xlu0 %v4275_v32, %s3875_s13  ;;  %v1713_v54 = vsel %vm1706_vm4, %v1680_v12, %v3276_v23  ;;  %v1714_v56 = vsel %vm1706_vm4, %v1681_v13, %v3277_v22  ;;  %v2746_v22 = vld [vmem:[%s3973_s15 + $0x152] sm:$0xff] }
  0xbf   : > { %v4287_v36 = vpop.permute.xlu1 %3284 }
  0xc0   : > { %v4289_v39 = vpop.permute.xlu0 %3279  ;;  %v3287_v29 = vunpack.i.h.bf16 %v4287_v36 }
  0xc1   : > { %3574 = vrot.lane.b32.xlu1 %v4275_v32, %s3868_s16  ;;  %v3282_v11 = vunpack.i.h.bf16 %v4289_v39  ;;  %v3281_v14 = vunpack.i.l.bf16 %v4289_v39 }
  0xc2   : > { %3569 = vrot.lane.b32.xlu0 %v4203_v15, %s3868_s16  ;;  %v3262_v15 = vunpack.i.h.bf16 %v3260_v30  ;;  %v3286_v30 = vunpack.i.l.bf16 %v4287_v36  ;;  %v2806_v36 = vld [vmem:[%s3973_s15 + $0x139] sm:$0xff]  ;;  %v1747_v61 = vsel %vm1739_vm5, %v1714_v56, %v3287_v29  ;;  %v4433_v29 = vld [vmem:[%s3973_s15 + $0x170] sm:$0xff] }
  0xc3   : > { %v4307_v59 = vpop.permute.xlu1 %3294  ;;  %v4373_v51 = vpack.i.bf16 %v2807_v48, %v2806_v36 }
  0xc4   : > { %v3290_v63 = vpop.permute.xlu0 %3289  ;;  %v1679_v19 = vsel %vm1673_vm3, %v1646_v25, %v3262_v15  ;;  %v3297_v16 = vunpack.i.h.bf16 %v4307_v59 }
  0xc5   : > { %3584 = vrot.lane.b32.xlu1 %v4298_v50, %s3870_s18  ;;  %v3292_v20 = vunpack.i.h.bf16 %v3290_v63  ;;  %v3291_v21 = vunpack.i.l.bf16 %v3290_v63  ;;  %v1712_v26 = vsel %vm1706_vm4, %v1679_v19, %v3272_v8 }
  0xc6   : > { %3579 = vrot.lane.b32.xlu0 %v4205_v18, %s3870_s18  ;;  %v1678_v18 = vsel %vm1673_vm3, %v1645_v24, %v3261_v3  ;;  %v1745_v33 = vsel %vm1739_vm5, %v1712_v26, %v3282_v11  ;;  %v1780_v2 = vsel %vm1772_vm6, %v1747_v61, %v3297_v16  ;;  %v4430_v26 = vld [vmem:[%s3973_s15 + $0x168] sm:$0xff] }
  0xc7   : > { %v3305_v10 = vpop.permute.xlu1 %3304  ;;  %v1711_v55 = vsel %vm1706_vm4, %v1678_v18, %v3271_v40  ;;  %v1778_v43 = vsel %vm1772_vm6, %v1745_v33, %v3292_v20  ;;  %v2838_v40 = vld [vmem:[%s3973_s15 + $0x13a] sm:$0xff]  ;;  %v2714_v20 = vld [vmem:[%s3973_s15 + $0x151] sm:$0xff] }
  0xc8   : > { %v3300_v17 = vpop.permute.xlu0 %3299  ;;  %v1744_v35 = vsel %vm1739_vm5, %v1711_v55, %v3281_v14  ;;  %v3307_v52 = vunpack.i.h.bf16 %v3305_v10  ;;  %v3306_v41 = vunpack.i.l.bf16 %v3305_v10  ;;  %v2839_v10 = vld [vmem:[%s3973_s15 + $0x142] sm:$0xff]  ;;  %v2747_v55 = vld [vmem:[%s3973_s15 + $0x15a] sm:$0xff] }
  0xc9   : > { %3594 = vrot.lane.b32.xlu1 %v4309_v60, %s3871_s19  ;;  %v3302_v27 = vunpack.i.h.bf16 %v3300_v17  ;;  %v3301_v28 = vunpack.i.l.bf16 %v3300_v17  ;;  %v1777_v42 = vsel %vm1772_vm6, %v1744_v35, %v3291_v21  ;;  %v4397_v13 = vpack.i.bf16 %v2839_v10, %v2838_v40  ;;  %v4408_v17 = vld [vmem:[%s3973_s15 + $0x150] sm:$0xff]  ;;  %v2715_v21 = vld [vmem:[%s3973_s15 + $0x159] sm:$0xff] }
  0xca   : > { %3589 = vrot.lane.b32.xlu0 %v4251_v9, %s3871_s19  ;;  %v3296_v9 = vunpack.i.l.bf16 %v4307_v59  ;;  %v1746_v59 = vsel %vm1739_vm5, %v1713_v54, %v3286_v30  ;;  %v1813_v5 = vsel %vm1805_vm7, %v1780_v2, %v3307_v52  ;;  %v4443_v48 = vpack.i.bf16 %v2747_v55, %v2746_v22  ;;  %v2811_v22 = vld [vmem:[%s3973_s15 + $0x171] sm:$0xff] }
  0xcb   : > { %v4349_v34 = vpop.permute.xlu1 %3314  ;;  %v1810_v53 = vsel %vm1805_vm7, %v1777_v42, %v3301_v28  ;;  %v1811_v31 = vsel %vm1805_vm7, %v1778_v43, %v3302_v27  ;;  %v4441_v43 = vpack.i.bf16 %v2715_v21, %v2714_v20  ;;  %v4447_v52 = vpack.i.bf16 %v4433_v29, %v4430_v26 }
  0xcc   : > { %v3310_v39 = vpop.permute.xlu0 %3309  ;;  %v3317_v30 = vunpack.i.h.bf16 %v4349_v34  ;;  %v3316_v35 = vunpack.i.l.bf16 %v4349_v34 }
  0xcd   : > { %v3312_v44 = vunpack.i.h.bf16 %v3310_v39  ;;  %v3311_v45 = vunpack.i.l.bf16 %v3310_v39  ;;  %3604 = vrot.lane.b32.xlu1 %v4311_v0, %s3872_s20 }
  0xce   : > { %3599 = vrot.lane.b32.xlu0 %v4275_v32, %s3872_s20  ;;  %v1779_v32 = vsel %vm1772_vm6, %v1746_v59, %v3296_v9  ;;  %v1617_v54 = vsel %vm1607_vm1, %v4046_v38, %v3317_v30 }
  0xcf   : > { %v1843_v57 = vsel %vm1838_vm8, %v1810_v53, %v3311_v45  ;;  %v1844_v58 = vsel %vm1838_vm8, %v1811_v31, %v3312_v44  ;;  %v4369_v49 = vpop.permute.xlu1 %3324  ;;  %v1812_v4 = vsel %vm1805_vm7, %v1779_v32, %v3306_v41  ;;  %v1616_v31 = vsel %vm1607_vm1, %v4043_v37, %v3316_v35 }
  0xd0   : > { %v3320_v62 = vpop.permute.xlu0 %3319  ;;  %v1873_v63 = vpack.c.bf16 %v1844_v58, %v1843_v57  ;;  %v3327_v23 = vunpack.i.h.bf16 %v4369_v49  ;;  %v3326_v27 = vunpack.i.l.bf16 %v4369_v49 }
  0xd1   : > { %v3322_v15 = vunpack.i.h.bf16 %v3320_v62  ;;  %v3321_v3 = vunpack.i.l.bf16 %v3320_v62  ;;  %3614 = vrot.lane.b32.xlu1 %v4313_v1, %s3873_s29 }
  0xd2   : > { %3609 = vrot.lane.b32.xlu0 %v4298_v50, %s3873_s29  ;;  %2972 = vmatprep.mubr.msk.bf16.mxu0 %vm1914_vm9, %v1873_v63  ;;  %v1618_v34 = vsel %vm1607_vm1, %v4061_v46, %v3326_v27 }
  0xd3   : > { %v1845_v6 = vsel %vm1838_vm8, %v1812_v4, %v3321_v3  ;;  %v1846_v7 = vsel %vm1838_vm8, %v1813_v5, %v3322_v15  ;;  %v3335_v24 = vpop.permute.xlu1 %3334 }
  0xd4   : > { %v3330_v25 = vpop.permute.xlu0 %3329  ;;  %v1874_v8 = vpack.c.bf16 %v1846_v7, %v1845_v6  ;;  %v3337_v33 = vunpack.i.h.bf16 %v3335_v24  ;;  %v3336_v16 = vunpack.i.l.bf16 %v3335_v24 }
  0xd5   : > { %3624 = vrot.lane.b32.xlu1 %v4373_v51, %s3874_s12  ;;  %v3332_v9 = vunpack.i.h.bf16 %v3330_v25  ;;  %v3331_v39 = vunpack.i.l.bf16 %v3330_v25 }
  0xd6   : > { %3619 = vrot.lane.b32.xlu0 %v4309_v60, %s3874_s12  ;;  %2973 = vmatmul.mubr.msk.bf16.gmra.mrb[4].mxu0 %vm1914_vm9, %v1874_v8  ;;  %v1651_v56 = vsel %vm1640_vm2, %v1618_v34, %v3336_v16 }
  0xd7   : > { %v3345_v50 = vpop.permute.xlu1 %3344  ;;  %v1649_v46 = vsel %vm1640_vm2, %v1616_v31, %v3331_v39 }
  0xd8   : > { %v3340_v12 = vpop.permute.xlu0 %3339  ;;  %v3347_v44 = vunpack.i.h.bf16 %v3345_v50  ;;  %v3346_v45 = vunpack.i.l.bf16 %v3345_v50 }
  0xd9   : > { %3634 = vrot.lane.b32.xlu1 %v4309_v60, %s3869_s17  ;;  %v4411_v60 = vld [vmem:[%s3973_s15 + $0x158] sm:$0xff]  ;;  %v3342_v41 = vunpack.i.h.bf16 %v3340_v12  ;;  %v3341_v53 = vunpack.i.l.bf16 %v3340_v12 }
  0xda   : > { %3629 = vrot.lane.b32.xlu0 %v4311_v0, %s3875_s13  ;;  %v4426_v28 = vpack.i.bf16 %v4411_v60, %v4408_v17  ;;  %v1684_v37 = vsel %vm1673_vm3, %v1651_v56, %v3346_v45 }
  0xdb   : > { %v4399_v11 = vpop.permute.xlu1 %3354 }
  0xdc   : > { %v4401_v14 = vpop.permute.xlu0 %3349  ;;  %v3357_v3 = vunpack.i.h.bf16 %v4399_v11  ;;  %v3356_v4 = vunpack.i.l.bf16 %v4399_v11 }
  0xdd   : > { %3644 = vrot.lane.b32.xlu1 %v4373_v51, %s3869_s17  ;;  %v3352_v58 = vunpack.i.h.bf16 %v4401_v14  ;;  %v3351_v49 = vunpack.i.l.bf16 %v4401_v14 }
  0xde   : > { %3639 = vrot.lane.b32.xlu0 %v4397_v13, %s3875_s13  ;;  %v1717_v35 = vsel %vm1706_vm4, %v1684_v37, %v3356_v4 }
  0xdf   : > { %v4413_v18 = vpop.permute.xlu1 %3364 }
  0xe0   : > { %v4415_v19 = vpop.permute.xlu0 %3359  ;;  %v3367_v25 = vunpack.i.h.bf16 %v4413_v18  ;;  %v3366_v8 = vunpack.i.l.bf16 %v4413_v18  ;;  %v2810_v18 = vld [vmem:[%s3973_s15 + $0x169] sm:$0xff] }
  0xe1   : > { %3654 = vrot.lane.b32.xlu1 %v4397_v13, %s3868_s16  ;;  %v3362_v61 = vunpack.i.h.bf16 %v4415_v19  ;;  %v3361_v62 = vunpack.i.l.bf16 %v4415_v19  ;;  %v4507_v34 = vpack.i.bf16 %v2811_v22, %v2810_v18 }
  0xe2   : > { %3649 = vrot.lane.b32.xlu0 %v4311_v0, %s3868_s16  ;;  %v1619_v0 = vsel %vm1607_vm1, %v4064_v47, %v3327_v23  ;;  %v1650_v47 = vsel %vm1640_vm2, %v1617_v54, %v3332_v9 }
  0xe3   : > { %v4439_v42 = vpop.permute.xlu1 %3374  ;;  %v1652_v57 = vsel %vm1640_vm2, %v1619_v0, %v3337_v33  ;;  %v1683_v32 = vsel %vm1673_vm3, %v1650_v47, %v3342_v41 }
  0xe4   : > { %v3370_v36 = vpop.permute.xlu0 %3369  ;;  %v1685_v38 = vsel %vm1673_vm3, %v1652_v57, %v3347_v44  ;;  %v1716_v24 = vsel %vm1706_vm4, %v1683_v32, %v3352_v58  ;;  %v3377_v12 = vunpack.i.h.bf16 %v4439_v42 }
  0xe5   : > { %3664 = vrot.lane.b32.xlu1 %v4426_v28, %s3870_s18  ;;  %v3372_v2 = vunpack.i.h.bf16 %v3370_v36  ;;  %v3371_v15 = vunpack.i.l.bf16 %v3370_v36  ;;  %v1749_v10 = vsel %vm1739_vm5, %v1716_v24, %v3362_v61  ;;  %v1718_v33 = vsel %vm1706_vm4, %v1685_v38, %v3357_v3  ;;  %v2750_v3 = vld [vmem:[%s3973_s15 + $0x182] sm:$0xff]  ;;  %v4560_v24 = vld [vmem:[%s3973_s15 + $0x198] sm:$0xff] }
  0xe6   : > { %3659 = vrot.lane.b32.xlu0 %v4313_v1, %s3870_s18  ;;  %v1682_v1 = vsel %vm1673_vm3, %v1649_v46, %v3341_v53  ;;  %v1751_v44 = vsel %vm1739_vm5, %v1718_v33, %v3367_v25  ;;  %v4563_v25 = vld [vmem:[%s3973_s15 + $0x1a0] sm:$0xff] }
  0xe7   : > { %v3385_v59 = vpop.permute.xlu1 %3384  ;;  %v1715_v7 = vsel %vm1706_vm4, %v1682_v1, %v3351_v49  ;;  %v1782_v19 = vsel %vm1772_vm6, %v1749_v10, %v3372_v2  ;;  %v1784_v0 = vsel %vm1772_vm6, %v1751_v44, %v3377_v12  ;;  %v2842_v49 = vld [vmem:[%s3973_s15 + $0x16a] sm:$0xff]  ;;  %v2718_v2 = vld [vmem:[%s3973_s15 + $0x181] sm:$0xff] }
  0xe8   : > { %v3380_v63 = vpop.permute.xlu0 %3379  ;;  %v1748_v40 = vsel %vm1739_vm5, %v1715_v7, %v3361_v62  ;;  %v3387_v23 = vunpack.i.h.bf16 %v3385_v59  ;;  %v3386_v27 = vunpack.i.l.bf16 %v3385_v59  ;;  %v2843_v59 = vld [vmem:[%s3973_s15 + $0x172] sm:$0xff]  ;;  %v2751_v7 = vld [vmem:[%s3973_s15 + $0x18a] sm:$0xff] }
  0xe9   : > { %3674 = vrot.lane.b32.xlu1 %v4441_v43, %s3871_s19  ;;  %v3382_v5 = vunpack.i.h.bf16 %v3380_v63  ;;  %v3381_v6 = vunpack.i.l.bf16 %v3380_v63  ;;  %v1781_v14 = vsel %vm1772_vm6, %v1748_v40, %v3371_v15  ;;  %v4533_v38 = vpack.i.bf16 %v2843_v59, %v2842_v49  ;;  %v2686_v63 = vld [vmem:[%s3973_s15 + $0x180] sm:$0xff]  ;;  %v2719_v15 = vld [vmem:[%s3973_s15 + $0x189] sm:$0xff] }
  0xea   : > { %3669 = vrot.lane.b32.xlu0 %v4373_v51, %s3871_s19  ;;  %v3376_v51 = vunpack.i.l.bf16 %v4439_v42  ;;  %v1750_v42 = vsel %vm1739_vm5, %v1717_v35, %v3366_v8  ;;  %v1817_v54 = vsel %vm1805_vm7, %v1784_v0, %v3387_v23  ;;  %v307_v10 = vld [vmem:[%s3973_s15 + $0xa8] sm:$0xff]  ;;  %v308_v12 = vld [vmem:[%s3973_s15 + $0xb0] sm:$0xff]  ;;  %v4575_v22 = vpack.i.bf16 %v2719_v15, %v2718_v2 }
  0xeb   : > { %v4483_v50 = vpop.permute.xlu1 %3394  ;;  %v1814_v55 = vsel %vm1805_vm7, %v1781_v14, %v3381_v6  ;;  %v1815_v30 = vsel %vm1805_vm7, %v1782_v19, %v3382_v5  ;;  %v305_v14 = vld [vmem:[%s3973_s15 + $0x90] sm:$0xff]  ;;  %v306_v19 = vld [vmem:[%s3973_s15 + $0x98] sm:$0xff] }
  0xec   : > { %v3390_v11 = vpop.permute.xlu0 %3389  ;;  %v3397_v8 = vunpack.i.h.bf16 %v4483_v50  ;;  %v3396_v40 = vunpack.i.l.bf16 %v4483_v50  ;;  %v3773_v50 = vpack.i.bf16 %v4563_v25, %v4560_v24 }
  0xed   : > { %v3392_v20 = vunpack.i.h.bf16 %v3390_v11  ;;  %v3391_v21 = vunpack.i.l.bf16 %v3390_v11  ;;  %3684 = vrot.lane.b32.xlu1 %v4443_v48, %s3872_s20 }
  0xee   : > { %3679 = vrot.lane.b32.xlu0 %v4397_v13, %s3872_s20  ;;  %v1783_v13 = vsel %vm1772_vm6, %v1750_v42, %v3376_v51 }
  0xef   : > { %v1847_v16 = vsel %vm1838_vm8, %v1814_v55, %v3391_v21  ;;  %v1848_v9 = vsel %vm1838_vm8, %v1815_v30, %v3392_v20  ;;  %v4503_v39 = vpop.permute.xlu1 %3404  ;;  %v1816_v31 = vsel %vm1805_vm7, %v1783_v13, %v3386_v27  ;;  %v4577_v30 = vpack.i.bf16 %v2751_v7, %v2750_v3 }
  0xf0   : > { %v1875_v45 = vpack.c.bf16 %v1848_v9, %v1847_v16  ;;  %v3400_v36 = vpop.permute.xlu0 %3399  ;;  %v3407_v4 = vunpack.i.h.bf16 %v4503_v39  ;;  %v3406_v5 = vunpack.i.l.bf16 %v4503_v39  ;;  %v1620_v9 = vsel %vm1607_vm1, %v305_v14, %v3396_v40 }
  0xf1   : > { %v3402_v41 = vunpack.i.h.bf16 %v3400_v36  ;;  %v3401_v53 = vunpack.i.l.bf16 %v3400_v36  ;;  %3694 = vrot.lane.b32.xlu1 %v4447_v52, %s3873_s29  ;;  %v1621_v39 = vsel %vm1607_vm1, %v306_v19, %v3397_v8 }
  0xf2   : > { %3689 = vrot.lane.b32.xlu0 %v4426_v28, %s3873_s29  ;;  %2976 = vmatprep.mubr.msk.bf16.mxu0 %vm1914_vm9, %v1875_v45  ;;  %v1622_v35 = vsel %vm1607_vm1, %v307_v10, %v3406_v5  ;;  %v2815_v10 = vld [vmem:[%s3973_s15 + $0x1a1] sm:$0xff] }
  0xf3   : > { %v1849_v56 = vsel %vm1838_vm8, %v1816_v31, %v3401_v53  ;;  %v1850_v57 = vsel %vm1838_vm8, %v1817_v54, %v3402_v41  ;;  %v3415_v46 = vpop.permute.xlu1 %3414 }
  0xf4   : > { %v1876_v47 = vpack.c.bf16 %v1850_v57, %v1849_v56  ;;  %v3410_v58 = vpop.permute.xlu0 %3409  ;;  %v3417_v51 = vunpack.i.h.bf16 %v3415_v46  ;;  %v3416_v11 = vunpack.i.l.bf16 %v3415_v46 }
  0xf5   : > { %3704 = vrot.lane.b32.xlu1 %v4507_v34, %s3874_s12  ;;  %v3412_v20 = vunpack.i.h.bf16 %v3410_v58  ;;  %v3411_v21 = vunpack.i.l.bf16 %v3410_v58 }
  0xf6   : > { %3699 = vrot.lane.b32.xlu0 %v4441_v43, %s3874_s12  ;;  %2977 = vmatmul.mubr.msk.bf16.gmra.mrb[8].mxu0 %vm1914_vm9, %v1876_v47  ;;  %v1655_v42 = vsel %vm1640_vm2, %v1622_v35, %v3416_v11 }
  0xf7   : > { %v3425_v28 = vpop.permute.xlu1 %3424  ;;  %v1653_v45 = vsel %vm1640_vm2, %v1620_v9, %v3411_v21  ;;  %v1654_v36 = vsel %vm1640_vm2, %v1621_v39, %v3412_v20 }
  0xf8   : > { %v4527_v37 = vpop.permute.xlu0 %3419  ;;  %v3427_v23 = vunpack.i.h.bf16 %v3425_v28  ;;  %v3426_v27 = vunpack.i.l.bf16 %v3425_v28 }
  0xf9   : > { %3714 = vrot.lane.b32.xlu1 %v4441_v43, %s3869_s17  ;;  %v2687_v43 = vld [vmem:[%s3973_s15 + $0x188] sm:$0xff]  ;;  %v3422_v33 = vunpack.i.h.bf16 %v4527_v37  ;;  %v3421_v16 = vunpack.i.l.bf16 %v4527_v37 }
  0xfa   : > { %3709 = vrot.lane.b32.xlu0 %v4443_v48, %s3875_s13  ;;  %v4556_v6 = vpack.i.bf16 %v2687_v43, %v2686_v63  ;;  %v1688_v53 = vsel %vm1673_vm3, %v1655_v42, %v3426_v27 }
  0xfb   : > { %v4535_v61 = vpop.permute.xlu1 %3434  ;;  %v1687_v46 = vsel %vm1673_vm3, %v1654_v36, %v3422_v33  ;;  %v2847_v36 = vld [vmem:[%s3973_s15 + $0x1a2] sm:$0xff] }
  0xfc   : > { %v4537_v62 = vpop.permute.xlu0 %3429  ;;  %v3437_v28 = vunpack.i.h.bf16 %v4535_v61  ;;  %v3436_v49 = vunpack.i.l.bf16 %v4535_v61 }
  0xfd   : > { %3724 = vrot.lane.b32.xlu1 %v4507_v34, %s3869_s17  ;;  %v3432_v13 = vunpack.i.h.bf16 %v4537_v62  ;;  %v3431_v0 = vunpack.i.l.bf16 %v4537_v62 }
  0xfe   : > { %3719 = vrot.lane.b32.xlu0 %v4533_v38, %s3875_s13  ;;  %v1721_v19 = vsel %vm1706_vm4, %v1688_v53, %v3436_v49 }
  0xff   : > { %v4545_v1 = vpop.permute.xlu1 %3444  ;;  %v1720_v63 = vsel %vm1706_vm4, %v1687_v46, %v3432_v13 }
 0x100   : > { %v4547_v32 = vpop.permute.xlu0 %3439  ;;  %v3447_v43 = vunpack.i.h.bf16 %v4545_v1 }
 0x101   : > { %3734 = vrot.lane.b32.xlu1 %v4533_v38, %s3868_s16  ;;  %v3442_v54 = vunpack.i.h.bf16 %v4547_v32  ;;  %v3441_v56 = vunpack.i.l.bf16 %v4547_v32  ;;  %v3446_v32 = vunpack.i.l.bf16 %v4545_v1  ;;  %v2814_v1 = vld [vmem:[%s3973_s15 + $0x199] sm:$0xff] }
 0x102   : > { %3729 = vrot.lane.b32.xlu0 %v4443_v48, %s3868_s16  ;;  %v1623_v48 = vsel %vm1607_vm1, %v308_v12, %v3407_v4  ;;  %v3783_v33 = vpack.i.bf16 %v2815_v10, %v2814_v1 }
 0x103   : > { %v4573_v18 = vpop.permute.xlu1 %3454  ;;  %v1656_v44 = vsel %vm1640_vm2, %v1623_v48, %v3417_v51  ;;  %v1753_v61 = vsel %vm1739_vm5, %v1720_v63, %v3442_v54  ;;  %v1754_v27 = vsel %vm1739_vm5, %v1721_v19, %v3446_v32 }
 0x104   : > { %v3450_v55 = vpop.permute.xlu0 %3449  ;;  %v1689_v31 = vsel %vm1673_vm3, %v1656_v44, %v3427_v23  ;;  %v3457_v3 = vunpack.i.h.bf16 %v4573_v18 }
 0x105   : > { %3744 = vrot.lane.b32.xlu1 %v4556_v6, %s3870_s18  ;;  %v3452_v47 = vunpack.i.h.bf16 %v3450_v55  ;;  %v3451_v58 = vunpack.i.l.bf16 %v3450_v55  ;;  %v1722_v20 = vsel %vm1706_vm4, %v1689_v31, %v3437_v28  ;;  %v312_v28 = vld [vmem:[%s3973_s15 + $0xe0] sm:$0xff] }
 0x106   : > { %3739 = vrot.lane.b32.xlu0 %v4447_v52, %s3870_s18  ;;  %v1686_v52 = vsel %vm1673_vm3, %v1653_v45, %v3421_v16  ;;  %v1755_v55 = vsel %vm1739_vm5, %v1722_v20, %v3447_v43  ;;  %v2846_v45 = vld [vmem:[%s3973_s15 + $0x19a] sm:$0xff]  ;;  %s282_s18 = sand.u32 1, %s3858_s25  }
 0x107   : > { %v3465_v41 = vpop.permute.xlu1 %3464  ;;  %v1719_v62 = vsel %vm1706_vm4, %v1686_v52, %v3431_v0  ;;  %v1786_v7 = vsel %vm1772_vm6, %v1753_v61, %v3452_v47  ;;  %v1788_v16 = vsel %vm1772_vm6, %v1755_v55, %v3457_v3  ;;  %v3793_v24 = vpack.i.bf16 %v2847_v36, %v2846_v45 }
 0x108   : > { %v3460_v57 = vpop.permute.xlu0 %3459  ;;  %v1752_v15 = vsel %vm1739_vm5, %v1719_v62, %v3441_v56  ;;  %v3467_v12 = vunpack.i.h.bf16 %v3465_v41  ;;  %v3466_v51 = vunpack.i.l.bf16 %v3465_v41  ;;  %v310_v62 = vld [vmem:[%s3973_s15 + $0xc8] sm:$0xff] }
 0x109   : > { %3754 = vrot.lane.b32.xlu1 %v4575_v22, %s3871_s19  ;;  %v3462_v59 = vunpack.i.h.bf16 %v3460_v57  ;;  %v3461_v37 = vunpack.i.l.bf16 %v3460_v57  ;;  %v1785_v5 = vsel %vm1772_vm6, %v1752_v15, %v3451_v58  ;;  %v311_v58 = vld [vmem:[%s3973_s15 + $0xd8] sm:$0xff] }
 0x10a   : > { %3749 = vrot.lane.b32.xlu0 %v4507_v34, %s3871_s19  ;;  %v3456_v34 = vunpack.i.l.bf16 %v4573_v18  ;;  %v1821_v44 = vsel %vm1805_vm7, %v1788_v16, %v3467_v12  ;;  %s2885_s19 = sshll.u32 %s3941_s5, 4 }
 0x10b   : > { %v4613_v2 = vpop.permute.xlu1 %3474  ;;  %v1818_v11 = vsel %vm1805_vm7, %v1785_v5, %v3461_v37  ;;  %v1819_v14 = vsel %vm1805_vm7, %v1786_v7, %v3462_v59  ;;  %v309_v37 = vld [vmem:[%s3973_s15 + $0xc0] sm:$0xff]  ;;  %s4976_s6 = scalar_lea.hbm %s5027_s7, %s2885_s19 }
 0x10c   : > { %v3470_v4 = vpop.permute.xlu0 %3469  ;;  %v3476_v47 = vunpack.i.l.bf16 %v4613_v2 }
 0x10d   : > { %v3472_v8 = vunpack.i.h.bf16 %v3470_v4  ;;  %v3471_v40 = vunpack.i.l.bf16 %v3470_v4  ;;  %3764 = vrot.lane.b32.xlu1 %v4577_v30, %s3872_s20 }
 0x10e   : > { %3759 = vrot.lane.b32.xlu0 %v4533_v38, %s3872_s20  ;;  %v1787_v38 = vsel %vm1772_vm6, %v1754_v27, %v3456_v34  ;;  %s283_s20 = scalar_lea.vmem [#allocation3], %s282_s18 }
 0x10f   : > { %v1851_v21 = vsel %vm1838_vm8, %v1818_v11, %v3471_v40  ;;  %v1852_v18 = vsel %vm1838_vm8, %v1819_v14, %v3472_v8  ;;  %v3485_v23 = vpop.permute.xlu1 %3484  ;;  %v1820_v42 = vsel %vm1805_vm7, %v1787_v38, %v3466_v51  ;;  %s2587_s21 = sshll.u32 %s283_s20, 4  ;;  %s4978_s21 = int_to_ptr.vmem [resolvable:$true] %s2587_s21 }
 0x110   : > { %v1877_v35 = vpack.c.bf16 %v1852_v18, %v1851_v21  ;;  %v3480_v48 = vpop.permute.xlu0 %3479  ;;  %v3487_v52 = vunpack.i.h.bf16 %v3485_v23  ;;  %v3486_v46 = vunpack.i.l.bf16 %v3485_v23  ;;  %s3804_s5 = scalar_lea.vmem %s4978_s21, 16  ;;  %p3811_p0 = scmp.lt.s32.totalorder %s4978_s21, %s3809_s11 }
 0x111   : > { %v3482_v9 = vunpack.i.h.bf16 %v3480_v48  ;;  %v3481_v39 = vunpack.i.l.bf16 %v3480_v48  ;;  %3774 = vrot.lane.b32.xlu1 %v3773_v50, %s3873_s29  ;;  %p3805_p11 = scmp.ne.s32.totalorder %s4978_s21, %s3804_s5 }
 0x112   : > { %3769 = vrot.lane.b32.xlu0 %v4556_v6, %s3873_s29  ;;  %2980 = vmatprep.mubr.msk.bf16.mxu0 %vm1914_vm9, %v1877_v35  ;;  %v1626_v3 = vsel %vm1607_vm1, %v311_v58, %v3486_v46  ;;  %v1627_v34 = vsel %vm1607_vm1, %v312_v28, %v3487_v52  ;;  %s2575_s29 = scalar_lea.sflag [#allocation4], %s282_s18 }
 0x113   : > { %v1853_v13 = vsel %vm1838_vm8, %v1820_v42, %v3481_v39  ;;  %v1854_v0 = vsel %vm1838_vm8, %v1821_v44, %v3482_v9  ;;  %v3495_v41 = vpop.permute.xlu1 %3494  ;;  %p3806_p12 = pnand %p3805_p11, %p3958_p5 }
 0x114   : > { %v1878_v53 = vpack.c.bf16 %v1854_v0, %v1853_v13  ;;  %v3490_v31 = vpop.permute.xlu0 %3489  ;;  %v3497_v49 = vunpack.i.h.bf16 %v3495_v41  ;;  %v3496_v59 = vunpack.i.l.bf16 %v3495_v41 }
 0x115   : > { %3784 = vrot.lane.b32.xlu1 %v3783_v33, %s3874_s12  ;;  %v3492_v63 = vunpack.i.h.bf16 %v3490_v31  ;;  %p3807_p13 = pneg %p3806_p12 }
 0x116   : > { %3779 = vrot.lane.b32.xlu0 %v4575_v22, %s3874_s12  ;;  %2981 = vmatmul.mubr.msk.bf16.gmra.mrb[12].mxu0 %vm1914_vm9, %v1878_v53  ;;  %v3477_v22 = vunpack.i.h.bf16 %v4613_v2  ;;  %v1624_v2 = vsel %vm1607_vm1, %v309_v37, %v3476_v47  ;;  %v1659_v8 = vsel %vm1640_vm2, %v1626_v3, %v3496_v59  ;;  %v1660_v40 = vsel %vm1640_vm2, %v1627_v34, %v3497_v49  ;;  %s3810_s12 = scalar_lea.vmem %s3809_s11, 32 }
 0x117   : > { %v3505_v6 = vpop.permute.xlu1 %3504  ;;  %p3812_p1 = scmp.lt.s32.totalorder %s3810_s12, %s3804_s5 }
 0x118   : > { %v3500_v25 = vpop.permute.xlu0 %3499  ;;  %v3507_v32 = vunpack.i.h.bf16 %v3505_v6  ;;  %v3506_v15 = vunpack.i.l.bf16 %v3505_v6  ;;  %v1625_v7 = vsel %vm1607_vm1, %v310_v62, %v3477_v22 }
 0x119   : > { %3794 = vrot.lane.b32.xlu1 %v3793_v24, %s3875_s13  ;;  %v3502_v4 = vunpack.i.h.bf16 %v3500_v25  ;;  %v3501_v5 = vunpack.i.l.bf16 %v3500_v25  ;;  %v1658_v10 = vsel %vm1640_vm2, %v1625_v7, %v3492_v63  ;;  %p3813_p2 = por %p3812_p1, %p3811_p0 }
 0x11a   : > { %3789 = vrot.lane.b32.xlu0 %v4577_v30, %s3875_s13  ;;  %v3491_v30 = vunpack.i.l.bf16 %v3490_v31  ;;  %v1692_v14 = vsel %vm1673_vm3, %v1659_v8, %v3506_v15  ;;  %v1693_v19 = vsel %vm1673_vm3, %v1660_v40, %v3507_v32 }
 0x11b   : > { %v4657_v50 = vpop.permute.xlu1 %3514  ;;  %v1691_v27 = vsel %vm1673_vm3, %v1658_v10, %v3502_v4  ;;  %p3814_p3 = pnand %p3813_p2, %p3807_p13 }
 0x11c   : > { %v3510_v54 = vpop.permute.xlu0 %3509  ;;  %v1657_v1 = vsel %vm1640_vm2, %v1624_v2, %v3491_v30  ;;  %v3517_v48 = vunpack.i.h.bf16 %v4657_v50  ;;  %v3516_v33 = vunpack.i.l.bf16 %v4657_v50 }
 0x11d   : > { %v3512_v12 = vunpack.i.h.bf16 %v3510_v54  ;;  %v3511_v51 = vunpack.i.l.bf16 %v3510_v54  ;;  %v1690_v23 = vsel %vm1673_vm3, %v1657_v1, %v3501_v5 }
 0x11e   : > { %v1725_v52 = vsel %vm1706_vm4, %v1692_v14, %v3516_v33  ;;  %v1726_v46 = vsel %vm1706_vm4, %v1693_v19, %v3517_v48  ;;  %v315_v19 = vld [vmem:[%s3973_s15 + $0x108] sm:$0xff] }
 0x11f   : > { %v4659_v56 = vpop.permute.xlu1 %3524  ;;  %v1723_v9 = vsel %vm1706_vm4, %v1690_v23, %v3511_v51  ;;  %v1724_v39 = vsel %vm1706_vm4, %v1691_v27, %v3512_v12  ;;  %v313_v23 = vld [vmem:[%s3973_s15 + $0xf0] sm:$0xff]  ;;  %v314_v27 = vld [vmem:[%s3973_s15 + $0xf8] sm:$0xff] }
 0x120   : > { %v3520_v57 = vpop.permute.xlu0 %3519  ;;  %v3527_v42 = vunpack.i.h.bf16 %v4659_v56  ;;  %v3526_v44 = vunpack.i.l.bf16 %v4659_v56 }
 0x121   : > { %v3522_v20 = vunpack.i.h.bf16 %v3520_v57  ;;  %v3521_v21 = vunpack.i.l.bf16 %v3520_v57 }
 0x122   : > { %v1758_v28 = vsel %vm1739_vm5, %v1725_v52, %v3526_v44  ;;  %v1759_v49 = vsel %vm1739_vm5, %v1726_v46, %v3527_v42 }
 0x123   : > { %v3535_v43 = vpop.permute.xlu1 %3534  ;;  %v1756_v36 = vsel %vm1739_vm5, %v1723_v9, %v3521_v21  ;;  %v1757_v13 = vsel %vm1739_vm5, %v1724_v39, %v3522_v20  ;;  %v316_v20 = vld [vmem:[%s3973_s15 + $0x110] sm:$0xff] }
 0x124   : > { %v3530_v61 = vpop.permute.xlu0 %3529  ;;  %v3537_v0 = vunpack.i.h.bf16 %v3535_v43  ;;  %v3536_v41 = vunpack.i.l.bf16 %v3535_v43 }
 0x125   : > { %v3532_v55 = vunpack.i.h.bf16 %v3530_v61  ;;  %v3531_v35 = vunpack.i.l.bf16 %v3530_v61 }
 0x126   : > { %v1791_v62 = vsel %vm1772_vm6, %v1758_v28, %v3536_v41  ;;  %v1792_v63 = vsel %vm1772_vm6, %v1759_v49, %v3537_v0 }
 0x127   : > { %v3545_v11 = vpop.permute.xlu1 %3544  ;;  %v1789_v31 = vsel %vm1772_vm6, %v1756_v36, %v3531_v35  ;;  %v1790_v24 = vsel %vm1772_vm6, %v1757_v13, %v3532_v55 }
 0x128   : > { %v3540_v18 = vpop.permute.xlu0 %3539  ;;  %v3547_v50 = vunpack.i.h.bf16 %v3545_v11  ;;  %v3546_v54 = vunpack.i.l.bf16 %v3545_v11 }
 0x129   : > { %v3542_v38 = vunpack.i.h.bf16 %v3540_v18  ;;  %v3541_v16 = vunpack.i.l.bf16 %v3540_v18 }
 0x12a   : > { %v1824_v32 = vsel %vm1805_vm7, %v1791_v62, %v3546_v54  ;;  %v1825_v15 = vsel %vm1805_vm7, %v1792_v63, %v3547_v50 }
 0x12b   : > { %v4685_v45 = vpop.permute.xlu1 %3554  ;;  %v1822_v57 = vsel %vm1805_vm7, %v1789_v31, %v3541_v16  ;;  %v1823_v56 = vsel %vm1805_vm7, %v1790_v24, %v3542_v38 }
 0x12c   : > { %v3550_v53 = vpop.permute.xlu0 %3549  ;;  %v3557_v11 = vunpack.i.h.bf16 %v4685_v45  ;;  %v3556_v14 = vunpack.i.l.bf16 %v4685_v45 }
 0x12d   : > { %v3552_v6 = vunpack.i.h.bf16 %v3550_v53  ;;  %v3551_v25 = vunpack.i.l.bf16 %v3550_v53 }
 0x12e   : > { %v1628_v45 = vsel %vm1607_vm1, %v313_v23, %v3556_v14  ;;  %v1629_v36 = vsel %vm1607_vm1, %v314_v27, %v3557_v11 }
 0x12f   : > { %v1855_v22 = vsel %vm1838_vm8, %v1822_v57, %v3551_v25  ;;  %v1856_v47 = vsel %vm1838_vm8, %v1823_v56, %v3552_v6  ;;  %v3565_v58 = vpop.permute.xlu1 %3564 }
 0x130   : > { %v1879_v59 = vpack.c.bf16 %v1856_v47, %v1855_v22  ;;  %v3560_v37 = vpop.permute.xlu0 %3559  ;;  %v3567_v12 = vunpack.i.h.bf16 %v3565_v58  ;;  %v3566_v51 = vunpack.i.l.bf16 %v3565_v58 }
 0x131   : > { %v3562_v30 = vunpack.i.h.bf16 %v3560_v37  ;;  %v3561_v43 = vunpack.i.l.bf16 %v3560_v37 }
 0x132   : > { %2984 = vmatprep.mubr.msk.bf16.mxu0 %vm1914_vm9, %v1879_v59  ;;  %v1630_v9 = vsel %vm1607_vm1, %v315_v19, %v3566_v51  ;;  %v1631_v39 = vsel %vm1607_vm1, %v316_v20, %v3567_v12 }
 0x133   : > { %v1857_v61 = vsel %vm1838_vm8, %v1824_v32, %v3561_v43  ;;  %v1858_v3 = vsel %vm1838_vm8, %v1825_v15, %v3562_v30  ;;  %v3575_v34 = vpop.permute.xlu1 %3574 }
 0x134   : > { %v1880_v4 = vpack.c.bf16 %v1858_v3, %v1857_v61  ;;  %v3570_v5 = vpop.permute.xlu0 %3569  ;;  %v3577_v21 = vunpack.i.h.bf16 %v3575_v34  ;;  %v3576_v18 = vunpack.i.l.bf16 %v3575_v34 }
 0x135   : > { %v3572_v55 = vunpack.i.h.bf16 %v3570_v5  ;;  %v3571_v35 = vunpack.i.l.bf16 %v3570_v5 }
 0x136   : > { %2985 = vmatmul.mubr.msk.bf16.gmra.mrb[16].mxu0 %vm1914_vm9, %v1880_v4  ;;  %v1663_v13 = vsel %vm1640_vm2, %v1630_v9, %v3576_v18  ;;  %v1664_v0 = vsel %vm1640_vm2, %v1631_v39, %v3577_v21 }
 0x137   : > { %v3585_v2 = vpop.permute.xlu1 %3584  ;;  %v1661_v41 = vsel %vm1640_vm2, %v1628_v45, %v3571_v35  ;;  %v1662_v53 = vsel %vm1640_vm2, %v1629_v36, %v3572_v55 }
 0x138   : > { %v3580_v7 = vpop.permute.xlu0 %3579  ;;  %v3587_v33 = vunpack.i.h.bf16 %v3585_v2  ;;  %v3586_v38 = vunpack.i.l.bf16 %v3585_v2 }
 0x139   : > { %v3582_v42 = vunpack.i.h.bf16 %v3580_v7  ;;  %v3581_v44 = vunpack.i.l.bf16 %v3580_v7 }
 0x13a   : > { %v1696_v25 = vsel %vm1673_vm3, %v1663_v13, %v3586_v38  ;;  %v1697_v50 = vsel %vm1673_vm3, %v1664_v0, %v3587_v33 }
 0x13b   : > { %v4707_v8 = vpop.permute.xlu1 %3594  ;;  %v1694_v52 = vsel %vm1673_vm3, %v1661_v41, %v3581_v44  ;;  %v1695_v46 = vsel %vm1673_vm3, %v1662_v53, %v3582_v42 }
 0x13c   : > { %v3590_v40 = vpop.permute.xlu0 %3589  ;;  %v3597_v58 = vunpack.i.h.bf16 %v4707_v8  ;;  %v3596_v28 = vunpack.i.l.bf16 %v4707_v8 }
 0x13d   : > { %v3592_v31 = vunpack.i.h.bf16 %v3590_v40  ;;  %v3591_v24 = vunpack.i.l.bf16 %v3590_v40 }
 0x13e   : > { %v1729_v12 = vsel %vm1706_vm4, %v1696_v25, %v3596_v28  ;;  %v1730_v51 = vsel %vm1706_vm4, %v1697_v50, %v3597_v58 }
 0x13f   : > { %v4709_v1 = vpop.permute.xlu1 %3604  ;;  %v1727_v37 = vsel %vm1706_vm4, %v1694_v52, %v3591_v24  ;;  %v1728_v62 = vsel %vm1706_vm4, %v1695_v46, %v3592_v31 }
 0x140   : > { %v3600_v10 = vpop.permute.xlu0 %3599  ;;  %v3607_v63 = vunpack.i.h.bf16 %v4709_v1  ;;  %v3606_v30 = vunpack.i.l.bf16 %v4709_v1 }
 0x141   : > { %v3602_v54 = vunpack.i.h.bf16 %v3600_v10  ;;  %v3601_v57 = vunpack.i.l.bf16 %v3600_v10 }
 0x142   : > { %v1762_v20 = vsel %vm1739_vm5, %v1729_v12, %v3606_v30  ;;  %v1763_v21 = vsel %vm1739_vm5, %v1730_v51, %v3607_v63 }
 0x143   : > { %v3615_v48 = vpop.permute.xlu1 %3614  ;;  %v1760_v32 = vsel %vm1739_vm5, %v1727_v37, %v3601_v57  ;;  %v1761_v15 = vsel %vm1739_vm5, %v1728_v62, %v3602_v54  ;;  %v317_v57 = vld [vmem:[%s3973_s15 + $0x120] sm:$0xff] }
 0x144   : > { %v3610_v16 = vpop.permute.xlu0 %3609  ;;  %v3617_v61 = vunpack.i.h.bf16 %v3615_v48  ;;  %v3616_v3 = vunpack.i.l.bf16 %v3615_v48  ;;  %v3803_v37 = vld [vmem:[%s3973_s15 + $0x140] sm:$0xff] }
 0x145   : > { %v3612_v22 = vunpack.i.h.bf16 %v3610_v16  ;;  %v3611_v47 = vunpack.i.l.bf16 %v3610_v16 }
 0x146   : > { %v1795_v27 = vsel %vm1772_vm6, %v1762_v20, %v3616_v3  ;;  %v1796_v55 = vsel %vm1772_vm6, %v1763_v21, %v3617_v61 }
 0x147   : > { %v3625_v6 = vpop.permute.xlu1 %3624  ;;  %v1793_v4 = vsel %vm1772_vm6, %v1760_v32, %v3611_v47  ;;  %v1794_v5 = vsel %vm1772_vm6, %v1761_v15, %v3612_v22 }
 0x148   : > { %v3620_v56 = vpop.permute.xlu0 %3619  ;;  %v3627_v8 = vunpack.i.h.bf16 %v3625_v6  ;;  %v3626_v40 = vunpack.i.l.bf16 %v3625_v6 }
 0x149   : > { %v3622_v49 = vunpack.i.h.bf16 %v3620_v56  ;;  %v3621_v59 = vunpack.i.l.bf16 %v3620_v56  ;;  %v318_v56 = vld [vmem:[%s3973_s15 + $0x128] sm:$0xff] }
 0x14a   : > { %v1828_v33 = vsel %vm1805_vm7, %v1795_v27, %v3626_v40  ;;  %v1829_v38 = vsel %vm1805_vm7, %v1796_v55, %v3627_v8 }
 0x14b   : > { %v4735_v43 = vpop.permute.xlu1 %3634  ;;  %v1826_v10 = vsel %vm1805_vm7, %v1793_v4, %v3621_v59  ;;  %v1827_v1 = vsel %vm1805_vm7, %v1794_v5, %v3622_v49  ;;  %v3802_v49 = vld [vmem:[%s3973_s15 + $0x138] sm:$0xff] }
 0x14c   : > { %v3630_v34 = vpop.permute.xlu0 %3629  ;;  %v3637_v6 = vunpack.i.h.bf16 %v4735_v43  ;;  %v3636_v25 = vunpack.i.l.bf16 %v4735_v43 }
 0x14d   : > { %v3632_v2 = vunpack.i.h.bf16 %v3630_v34  ;;  %v3631_v7 = vunpack.i.l.bf16 %v3630_v34 }
 0x14e   : > { %v1632_v43 = vsel %vm1607_vm1, %v317_v57, %v3636_v25  ;;  %v1633_v32 = vsel %vm1607_vm1, %v318_v56, %v3637_v6 }
 0x14f   : > { %v1859_v11 = vsel %vm1838_vm8, %v1826_v10, %v3631_v7  ;;  %v1860_v14 = vsel %vm1838_vm8, %v1827_v1, %v3632_v2  ;;  %v3645_v19 = vpop.permute.xlu1 %3644 }
 0x150   : > { %v1881_v18 = vpack.c.bf16 %v1860_v14, %v1859_v11  ;;  %v3640_v23 = vpop.permute.xlu0 %3639  ;;  %v3647_v31 = vunpack.i.h.bf16 %v3645_v19  ;;  %v3646_v24 = vunpack.i.l.bf16 %v3645_v19 }
 0x151   : > { %v3642_v35 = vunpack.i.h.bf16 %v3640_v23  ;;  %v3641_v48 = vunpack.i.l.bf16 %v3640_v23 }
 0x152   : > { %2988 = vmatprep.mubr.msk.bf16.mxu0 %vm1914_vm9, %v1881_v18  ;;  %v1634_v59 = vsel %vm1607_vm1, %v3802_v49, %v3646_v24  ;;  %v1635_v62 = vsel %vm1607_vm1, %v3803_v37, %v3647_v31 }
 0x153   : > { %v1861_v16 = vsel %vm1838_vm8, %v1828_v33, %v3641_v48  ;;  %v1862_v9 = vsel %vm1838_vm8, %v1829_v38, %v3642_v35  ;;  %v3655_v39 = vpop.permute.xlu1 %3654 }
 0x154   : > { %v1882_v42 = vpack.c.bf16 %v1862_v9, %v1861_v16  ;;  %v3650_v44 = vpop.permute.xlu0 %3649  ;;  %v3657_v50 = vunpack.i.h.bf16 %v3655_v39  ;;  %v3656_v54 = vunpack.i.l.bf16 %v3655_v39 }
 0x155   : > { %v3652_v52 = vunpack.i.h.bf16 %v3650_v44  ;;  %v3651_v46 = vunpack.i.l.bf16 %v3650_v44 }
 0x156   : > { %2989 = vmatmul.mubr.msk.bf16.gmra.mrb[20].mxu0 %vm1914_vm9, %v1882_v42  ;;  %v1667_v15 = vsel %vm1640_vm2, %v1634_v59, %v3656_v54  ;;  %v1668_v61 = vsel %vm1640_vm2, %v1635_v62, %v3657_v50 }
 0x157   : > { %v3665_v45 = vpop.permute.xlu1 %3664  ;;  %v1665_v3 = vsel %vm1640_vm2, %v1632_v43, %v3651_v46  ;;  %v1666_v34 = vsel %vm1640_vm2, %v1633_v32, %v3652_v52 }
 0x158   : > { %v3660_v36 = vpop.permute.xlu0 %3659  ;;  %v3667_v47 = vunpack.i.h.bf16 %v3665_v45  ;;  %v3666_v58 = vunpack.i.l.bf16 %v3665_v45 }
 0x159   : > { %v3662_v63 = vunpack.i.h.bf16 %v3660_v36  ;;  %v3661_v30 = vunpack.i.l.bf16 %v3660_v36 }
 0x15a   : > { %v1700_v7 = vsel %vm1673_vm3, %v1667_v15, %v3666_v58  ;;  %v1701_v8 = vsel %vm1673_vm3, %v1668_v61, %v3667_v47 }
 0x15b   : > { %v4757_v13 = vpop.permute.xlu1 %3674  ;;  %v1698_v12 = vsel %vm1673_vm3, %v1665_v3, %v3661_v30  ;;  %v1699_v51 = vsel %vm1673_vm3, %v1666_v34, %v3662_v63 }
 0x15c   : > { %v3670_v0 = vpop.permute.xlu0 %3669  ;;  %v3677_v19 = vunpack.i.h.bf16 %v4757_v13  ;;  %v3676_v20 = vunpack.i.l.bf16 %v4757_v13 }
 0x15d   : > { %v3672_v4 = vunpack.i.h.bf16 %v3670_v0  ;;  %v3671_v5 = vunpack.i.l.bf16 %v3670_v0 }
 0x15e   : > { %v1733_v31 = vsel %vm1706_vm4, %v1700_v7, %v3676_v20  ;;  %v1734_v24 = vsel %vm1706_vm4, %v1701_v8, %v3677_v19 }
 0x15f   : > { %v4759_v41 = vpop.permute.xlu1 %3684  ;;  %v1731_v23 = vsel %vm1706_vm4, %v1698_v12, %v3671_v5  ;;  %v1732_v27 = vsel %vm1706_vm4, %v1699_v51, %v3672_v4 }
 0x160   : > { %v3680_v53 = vpop.permute.xlu0 %3679  ;;  %v3687_v55 = vunpack.i.h.bf16 %v4759_v41  ;;  %v3686_v35 = vunpack.i.l.bf16 %v4759_v41 }
 0x161   : > { %v3682_v40 = vunpack.i.h.bf16 %v3680_v53  ;;  %v3681_v10 = vunpack.i.l.bf16 %v3680_v53 }
 0x162   : > { %v1766_v54 = vsel %vm1739_vm5, %v1733_v31, %v3686_v35  ;;  %v1767_v57 = vsel %vm1739_vm5, %v1734_v24, %v3687_v55 }
 0x163   : > { %v3695_v22 = vpop.permute.xlu1 %3694  ;;  %v1764_v33 = vsel %vm1739_vm5, %v1731_v23, %v3681_v10  ;;  %v1765_v38 = vsel %vm1739_vm5, %v1732_v27, %v3682_v40 }
 0x164   : > { %v3690_v28 = vpop.permute.xlu0 %3689  ;;  %v3697_v16 = vunpack.i.h.bf16 %v3695_v22  ;;  %v3696_v9 = vunpack.i.l.bf16 %v3695_v22 }
 0x165   : > { %v3692_v11 = vunpack.i.h.bf16 %v3690_v28  ;;  %v3691_v14 = vunpack.i.l.bf16 %v3690_v28 }
 0x166   : > { %v1799_v46 = vsel %vm1772_vm6, %v1766_v54, %v3696_v9  ;;  %v1800_v22 = vsel %vm1772_vm6, %v1767_v57, %v3697_v16  ;;  %v4829_v57 = vld [vmem:[%s5022_s2] ss:$0 sm:$0xff] }
 0x167   : > { %v3705_v2 = vpop.permute.xlu1 %3704  ;;  %v1797_v42 = vsel %vm1772_vm6, %v1764_v33, %v3691_v14  ;;  %v1798_v44 = vsel %vm1772_vm6, %v1765_v38, %v3692_v11 }
 0x168   : > { %v3700_v1 = vpop.permute.xlu0 %3699  ;;  %v3707_v13 = vunpack.i.h.bf16 %v3705_v2  ;;  %v3706_v0 = vunpack.i.l.bf16 %v3705_v2 }
 0x169   : > { %v3702_v21 = vunpack.i.h.bf16 %v3700_v1  ;;  %v3701_v18 = vunpack.i.l.bf16 %v3700_v1 }
 0x16a   : > { %v1832_v28 = vsel %vm1805_vm7, %v1799_v46, %v3706_v0  ;;  %v1833_v49 = vsel %vm1805_vm7, %v1800_v22, %v3707_v13 }
 0x16b   : > { %v3715_v48 = vpop.permute.xlu1 %3714  ;;  %v1830_v53 = vsel %vm1805_vm7, %v1797_v42, %v3701_v18  ;;  %v1831_v41 = vsel %vm1805_vm7, %v1798_v44, %v3702_v21 }
 0x16c   : > { %v3710_v39 = vpop.permute.xlu0 %3709  ;;  %v3716_v15 = vunpack.i.l.bf16 %v3715_v48  ;;  %v3717_v3 = vunpack.i.h.bf16 %v3715_v48 }
 0x16d   : > { %v3712_v45 = vunpack.i.h.bf16 %v3710_v39  ;;  %v3711_v36 = vunpack.i.l.bf16 %v3710_v39 }
 0x16e   : > { %v1636_v10 = vsel %vm1607_vm1, %v4408_v17, %v3716_v15  ;;  %v1637_v12 = vsel %vm1607_vm1, %v4411_v60, %v3717_v3 }
 0x16f   : > { %v1863_v6 = vsel %vm1838_vm8, %v1830_v53, %v3711_v36  ;;  %v1864_v25 = vsel %vm1838_vm8, %v1831_v41, %v3712_v45  ;;  %v3725_v50 = vpop.permute.xlu1 %3724 }
 0x170   : > { %v1883_v56 = vpack.c.bf16 %v1864_v25, %v1863_v6  ;;  %v3720_v52 = vpop.permute.xlu0 %3719  ;;  %v3726_v34 = vunpack.i.l.bf16 %v3725_v50  ;;  %v3727_v5 = vunpack.i.h.bf16 %v3725_v50 }
 0x171   : > { %v3722_v47 = vunpack.i.h.bf16 %v3720_v52  ;;  %v3721_v58 = vunpack.i.l.bf16 %v3720_v52 }
 0x172   : > { %2992 = vmatprep.mubr.msk.bf16.mxu0 %vm1914_vm9, %v1883_v56  ;;  %v1638_v51 = vsel %vm1607_vm1, %v4430_v26, %v3726_v34  ;;  %v1639_v20 = vsel %vm1607_vm1, %v4433_v29, %v3727_v5 }
 0x173   : > { %v1865_v59 = vsel %vm1838_vm8, %v1832_v28, %v3721_v58  ;;  %v1866_v37 = vsel %vm1838_vm8, %v1833_v49, %v3722_v47  ;;  %v3735_v62 = vpop.permute.xlu1 %3734 }
 0x174   : > { %v1884_v63 = vpack.c.bf16 %v1866_v37, %v1865_v59  ;;  %v3730_v30 = vpop.permute.xlu0 %3729  ;;  %v3736_v2 = vunpack.i.l.bf16 %v3735_v62  ;;  %v3737_v7 = vunpack.i.h.bf16 %v3735_v62 }
 0x175   : > { %v3732_v8 = vunpack.i.h.bf16 %v3730_v30  ;;  %v3731_v40 = vunpack.i.l.bf16 %v3730_v30 }
 0x176   : > { %2993 = vmatmul.mubr.msk.bf16.gmra.mrb[24].mxu0 %vm1914_vm9, %v1884_v63  ;;  %v1671_v21 = vsel %vm1640_vm2, %v1638_v51, %v3736_v2  ;;  %v1672_v27 = vsel %vm1640_vm2, %v1639_v20, %v3737_v7 }
 0x177   : > { %v3745_v43 = vpop.permute.xlu1 %3744  ;;  %v1669_v17 = vsel %vm1640_vm2, %v1636_v10, %v3731_v40  ;;  %v1670_v55 = vsel %vm1640_vm2, %v1637_v12, %v3732_v8 }
 0x178   : > { %v3740_v32 = vpop.permute.xlu0 %3739  ;;  %v3747_v11 = vunpack.i.h.bf16 %v3745_v43  ;;  %v3746_v14 = vunpack.i.l.bf16 %v3745_v43 }
 0x179   : > { %v3742_v18 = vunpack.i.h.bf16 %v3740_v32  ;;  %v3741_v23 = vunpack.i.l.bf16 %v3740_v32 }
 0x17a   : > { %v1704_v16 = vsel %vm1673_vm3, %v1671_v21, %v3746_v14  ;;  %v1705_v29 = vsel %vm1673_vm3, %v1672_v27, %v3747_v11 }
 0x17b   : > { %v3755_v61 = vpop.permute.xlu1 %3754  ;;  %v1702_v44 = vsel %vm1673_vm3, %v1669_v17, %v3741_v23  ;;  %v1703_v45 = vsel %vm1673_vm3, %v1670_v55, %v3742_v18 }
 0x17c   : > { %v3750_v4 = vpop.permute.xlu0 %3749  ;;  %v3756_v60 = vunpack.i.l.bf16 %v3755_v61  ;;  %v3757_v35 = vunpack.i.h.bf16 %v3755_v61 }
 0x17d   : > { %v3752_v48 = vunpack.i.h.bf16 %v3750_v4  ;;  %v3751_v26 = vunpack.i.l.bf16 %v3750_v4 }
 0x17e   : > { %v1737_v0 = vsel %vm1706_vm4, %v1704_v16, %v3756_v60  ;;  %v1738_v24 = vsel %vm1706_vm4, %v1705_v29, %v3757_v35 }
 0x17f   : > { %v3765_v1 = vpop.permute.xlu1 %3764  ;;  %v1735_v6 = vsel %vm1706_vm4, %v1702_v44, %v3751_v26  ;;  %v1736_v25 = vsel %vm1706_vm4, %v1703_v45, %v3752_v48 }
 0x180   : > { %v3760_v19 = vpop.permute.xlu0 %3759  ;;  %v3766_v33 = vunpack.i.l.bf16 %v3765_v1  ;;  %v3767_v9 = vunpack.i.h.bf16 %v3765_v1 }
 0x181   : > { %v3761_v39 = vunpack.i.l.bf16 %v3760_v19  ;;  %v3762_v36 = vunpack.i.h.bf16 %v3760_v19 }
 0x182   : > { %v1770_v50 = vsel %vm1739_vm5, %v1737_v0, %v3766_v33  ;;  %v1771_v56 = vsel %vm1739_vm5, %v1738_v24, %v3767_v9 }
 0x183   : > { %v3775_v38 = vpop.permute.xlu1 %3774  ;;  %v1768_v52 = vsel %vm1739_vm5, %v1735_v6, %v3761_v39  ;;  %v1769_v58 = vsel %vm1739_vm5, %v1736_v25, %v3762_v36 }
 0x184   : > { %v3770_v42 = vpop.permute.xlu0 %3769  ;;  %v3776_v13 = vunpack.i.l.bf16 %v3775_v38  ;;  %v3777_v53 = vunpack.i.h.bf16 %v3775_v38 }
 0x185   : > { %v3772_v41 = vunpack.i.h.bf16 %v3770_v42  ;;  %v3771_v31 = vunpack.i.l.bf16 %v3770_v42 }
 0x186   : > { %v1803_v28 = vsel %vm1772_vm6, %v1770_v50, %v3776_v13  ;;  %v1804_v62 = vsel %vm1772_vm6, %v1771_v56, %v3777_v53 }
 0x187   : > { %v3785_v54 = vpop.permute.xlu1 %3784  ;;  %v1801_v63 = vsel %vm1772_vm6, %v1768_v52, %v3771_v31  ;;  %v1802_v30 = vsel %vm1772_vm6, %v1769_v58, %v3772_v41 }
 0x188   : > { %v3787_v46 = vunpack.i.h.bf16 %v3785_v54  ;;  %v3786_v22 = vunpack.i.l.bf16 %v3785_v54  ;;  %v3780_v47 = vpop.permute.xlu0 %3779 }
 0x189   : > { %v3782_v49 = vunpack.i.h.bf16 %v3780_v47  ;;  %v3781_v59 = vunpack.i.l.bf16 %v3780_v47  ;;  %v2970_v37 = vpop.f32.mrb[0].mxu0 }
 0x18a   : > { %v2010_v43 = vadd.f32 %v2970_v37, %v4829_v57  ;;  %v2001_v32 = vpop.f32.mrb[1].mxu0  ;;  %v1836_v15 = vsel %vm1805_vm7, %v1803_v28, %v3786_v22  ;;  %v1837_v61 = vsel %vm1805_vm7, %v1804_v62, %v3787_v46 }
 0x18b   : > { %v1834_v3 = vsel %vm1805_vm7, %v1801_v63, %v3781_v59  ;;  %v2002_v34 = vadd.f32 %v4829_v57, %v2001_v32  ;;  %v2971_v4 = vpop.f32.mrb[2].mxu0  ;;  %v3795_v5 = vpop.permute.xlu1 %3794  ;;  %v1835_v2 = vsel %vm1805_vm7, %v1802_v30, %v3782_v49 }
 0x18c   : > { %v2013_v7 = vadd.f32 %v2971_v4, %v4829_v57  ;;  %v3797_v8 = vunpack.i.h.bf16 %v3795_v5  ;;  %v3796_v40 = vunpack.i.l.bf16 %v3795_v5  ;;  %v3790_v10 = vpop.permute.xlu0 %3789  ;;  %v2004_v1 = vpop.f32.mrb[3].mxu0  ;;  %v2130_v12 = vmax.f32 %v2010_v43, 0.0 }
 0x18d   : > { %v3792_v51 = vunpack.i.h.bf16 %v3790_v10  ;;  %v3791_v11 = vunpack.i.l.bf16 %v3790_v10  ;;  %v2005_v14 = vadd.f32 %v4829_v57, %v2004_v1  ;;  %v2128_v19 = vmax.f32 %v2002_v34, 0.0 }
 0x18e   : > { %v2131_v20 = vmax.f32 %v2013_v7, 0.0  ;;  %v1869_v21 = vsel %vm1838_vm8, %v1836_v15, %v3796_v40  ;;  %v1870_v18 = vsel %vm1838_vm8, %v1837_v61, %v3797_v8 }
 0x18f   : > { %v1886_v23 = vpack.c.bf16 %v1870_v18, %v1869_v21  ;;  %v1867_v27 = vsel %vm1838_vm8, %v1834_v3, %v3791_v11  ;;  %v1868_v17 = vsel %vm1838_vm8, %v1835_v2, %v3792_v51  ;;  %v2129_v55 = vmax.f32 %v2005_v14, 0.0  ;;  %v4881_v2 = vld [vmem:[%s5023_s3] sm:$0xff] }
 0x190   : > { %v4850_v60 = vpack.c.bf16 %v2131_v20, %v2130_v12  ;;  %v1885_v35 = vpack.c.bf16 %v1868_v17, %v1867_v27  ;;  %v2162_v7 = vcombine.high %v4881_v2, %v4881_v2 }
 0x191   : > { %v3046_v48 = vpack.c.bf16 %v2129_v55, %v2128_v19 }
 0x192   : > { %2996 = vmatprep.mubr.msk.bf16.mxu0 %vm1914_vm9, %v1885_v35  ;;  %2228 = vmatprep.mubr.f32.mxu1 %v2162_v7  ;;  %v2871_v7 = vld [vmem:[%s5024_s4 + $0x38] sm:$0xff] }
 0x193   : > { %2997 = vmatmul.mubr.msk.bf16.gmra.mrb[28].mxu0 %vm1914_vm9, %v1886_v23 }
 0x1a9   : > { %v2974_v26 = vpop.f32.mrb[4].mxu0 }
 0x1aa   : > { %v2026_v33 = vadd.f32 %v2974_v26, %v4829_v57  ;;  %v2017_v38 = vpop.f32.mrb[5].mxu0 }
 0x1ab   : > { %v2018_v16 = vadd.f32 %v4829_v57, %v2017_v38  ;;  %v2975_v29 = vpop.f32.mrb[6].mxu0 }
 0x1ac   : > { %v2029_v9 = vadd.f32 %v2975_v29, %v4829_v57  ;;  %v2020_v39 = vpop.f32.mrb[7].mxu0  ;;  %v2134_v44 = vmax.f32 %v2026_v33, 0.0 }
 0x1ad   : > { %v2021_v42 = vadd.f32 %v4829_v57, %v2020_v39  ;;  %v2132_v36 = vmax.f32 %v2018_v16, 0.0 }
 0x1ae   : > { %v2135_v45 = vmax.f32 %v2029_v9, 0.0 }
 0x1af   : > { %v2133_v13 = vmax.f32 %v2021_v42, 0.0 }
 0x1b0   : > { %v4858_v0 = vpack.c.bf16 %v2135_v45, %v2134_v44 }
 0x1b1   : > { %v4860_v53 = vpack.c.bf16 %v2133_v13, %v2132_v36 }
 0x1c9   : > { %v2978_v41 = vpop.f32.mrb[8].mxu0 }
 0x1ca   : > { %v2042_v31 = vadd.f32 %v2978_v41, %v4829_v57  ;;  %v2033_v24 = vpop.f32.mrb[9].mxu0 }
 0x1cb   : > { %v2034_v6 = vadd.f32 %v4829_v57, %v2033_v24  ;;  %v2979_v25 = vpop.f32.mrb[10].mxu0 }
 0x1cc   : > { %v2045_v50 = vadd.f32 %v2979_v25, %v4829_v57  ;;  %v2036_v54 = vpop.f32.mrb[11].mxu0  ;;  %v2138_v52 = vmax.f32 %v2042_v31, 0.0 }
 0x1cd   : > { %v2037_v56 = vadd.f32 %v4829_v57, %v2036_v54  ;;  %v2136_v22 = vmax.f32 %v2034_v6, 0.0 }
 0x1ce   : > { %v2139_v46 = vmax.f32 %v2045_v50, 0.0 }
 0x1cf   : > { %v2137_v47 = vmax.f32 %v2037_v56, 0.0 }
 0x1d0   : > { %v4866_v58 = vpack.c.bf16 %v2139_v46, %v2138_v52 }
 0x1d1   : > { %v4868_v28 = vpack.c.bf16 %v2137_v47, %v2136_v22 }
 0x1e9   : > { %v2982_v49 = vpop.f32.mrb[12].mxu0 }
 0x1ea   : > { %v2058_v59 = vadd.f32 %v2982_v49, %v4829_v57  ;;  %v2049_v37 = vpop.f32.mrb[13].mxu0 }
 0x1eb   : > { %v2050_v62 = vadd.f32 %v4829_v57, %v2049_v37  ;;  %v2983_v63 = vpop.f32.mrb[14].mxu0 }
 0x1ec   : > { %v2061_v30 = vadd.f32 %v2983_v63, %v4829_v57  ;;  %v2052_v43 = vpop.f32.mrb[15].mxu0  ;;  %v2142_v15 = vmax.f32 %v2058_v59, 0.0 }
 0x1ed   : > { %v2053_v32 = vadd.f32 %v4829_v57, %v2052_v43  ;;  %v2140_v3 = vmax.f32 %v2050_v62, 0.0 }
 0x1ee   : > { %v2143_v61 = vmax.f32 %v2061_v30, 0.0 }
 0x1ef   : > { %v2141_v34 = vmax.f32 %v2053_v32, 0.0 }
 0x1f0   : > { %v4874_v4 = vpack.c.bf16 %v2143_v61, %v2142_v15 }
 0x1f1   : > { %v4876_v5 = vpack.c.bf16 %v2141_v34, %v2140_v3  ;;  %v2869_v3 = vld [vmem:[%s5024_s4 + $0x28] sm:$0xff]  ;;  %v3876_v34 = vmov 0.0|0.0  }
 0x209   : > { %v2986_v8 = vpop.f32.mrb[16].mxu0 }
 0x20a   : > { %v2074_v40 = vadd.f32 %v2986_v8, %v4829_v57  ;;  %v2065_v10 = vpop.f32.mrb[17].mxu0 }
 0x20b   : > { %v2066_v1 = vadd.f32 %v4829_v57, %v2065_v10  ;;  %v2987_v12 = vpop.f32.mrb[18].mxu0  ;;  %v2235_v10 = vld [vmem:[%s5024_s4 + $0x8] sm:$0xff] }
 0x20c   : > { %v2077_v51 = vadd.f32 %v2987_v12, %v4829_v57  ;;  %v2068_v11 = vpop.f32.mrb[19].mxu0  ;;  %v2146_v19 = vmax.f32 %v2074_v40, 0.0 }
 0x20d   : > { %v2069_v14 = vadd.f32 %v4829_v57, %v2068_v11  ;;  %v2144_v21 = vmax.f32 %v2066_v1, 0.0 }
 0x20e   : > { %v2147_v20 = vmax.f32 %v2077_v51, 0.0 }
 0x20f   : > { %v2145_v18 = vmax.f32 %v2069_v14, 0.0  ;;  %v2236_v14 = vld [vmem:[%s5024_s4 + $0x10] sm:$0xff] }
 0x210   : > { %v3048_v23 = vpack.c.bf16 %v2147_v20, %v2146_v19  ;;  %v2237_v19 = vld [vmem:[%s5024_s4 + $0x18] sm:$0xff] }
 0x211   : > { %v3044_v27 = vpack.c.bf16 %v2145_v18, %v2144_v21  ;;  %v3086_v20 = vpack.c.bf16 %v2237_v19, %v2236_v14  ;;  %v2874_v21 = vld [vmem:[%s5024_s4 + $0x40] sm:$0xff]  ;;  %v2875_v18 = vld [vmem:[%s5024_s4 + $0x48] sm:$0xff] }
 0x213   : > { %3045 = vmatprep.subr.bf16.mxu1 %v3044_v27  ;;  %v2876_v27 = vld [vmem:[%s5024_s4 + $0x50] sm:$0xff] }
 0x214   : > { %3047 = vmatpush3.bf16.msra.mxu1 %v3046_v48 }
 0x215   : > { %3049 = vmatprep.subr.bf16.mxu1 %v3048_v23  ;;  %v3089_v23 = vpack.c.bf16 %v2875_v18, %v2874_v21 }
 0x218   : > { %3051 = vmatpush3.bf16.msra.mxu1 %v4850_v60 }
 0x229   : > { %v2990_v17 = vpop.f32.mrb[20].mxu0 }
 0x22a   : > { %v2090_v55 = vadd.f32 %v2990_v17, %v4829_v57  ;;  %v2081_v35 = vpop.f32.mrb[21].mxu0  ;;  %v2877_v17 = vld [vmem:[%s5024_s4 + $0x58] sm:$0xff] }
 0x22b   : > { %v2082_v26 = vadd.f32 %v4829_v57, %v2081_v35  ;;  %v2991_v33 = vpop.f32.mrb[22].mxu0  ;;  %v2879_v35 = vld [vmem:[%s5024_s4 + $0x60] sm:$0xff] }
 0x22c   : > { %v2093_v38 = vadd.f32 %v2991_v33, %v4829_v57  ;;  %v2084_v16 = vpop.f32.mrb[23].mxu0  ;;  %v2150_v9 = vmax.f32 %v2090_v55, 0.0  ;;  %v3092_v55 = vpack.c.bf16 %v2877_v17, %v2876_v27 }
 0x22d   : > { %v2085_v29 = vadd.f32 %v4829_v57, %v2084_v16  ;;  %v2148_v42 = vmax.f32 %v2082_v26, 0.0  ;;  %v2880_v26 = vld [vmem:[%s5024_s4 + $0x68] sm:$0xff]  ;;  %v2881_v16 = vld [vmem:[%s5024_s4 + $0x70] sm:$0xff] }
 0x22e   : > { %v2151_v39 = vmax.f32 %v2093_v38, 0.0  ;;  %v3095_v33 = vpack.c.bf16 %v2880_v26, %v2879_v35 }
 0x22f   : > { %v2149_v44 = vmax.f32 %v2085_v29, 0.0  ;;  %v2882_v29 = vld [vmem:[%s5024_s4 + $0x78] sm:$0xff] }
 0x230   : > { %v3056_v48 = vpack.c.bf16 %v2151_v39, %v2150_v9  ;;  %v3098_v9 = vpack.c.bf16 %v2882_v29, %v2881_v16 }
 0x231   : > { %v3052_v45 = vpack.c.bf16 %v2149_v44, %v2148_v42 }
 0x233   : > { %3053 = vmatprep.subr.bf16.mxu1 %v3052_v45  ;;  %v2551_v45 = vlaneseq }
 0x234   : > { %3055 = vmatpush3.bf16.msra.mxu1 %v4860_v53 }
 0x235   : > { %3057 = vmatprep.subr.bf16.mxu1 %v3056_v48 }
 0x238   : > { %3059 = vmatpush3.bf16.msra.mxu1 %v4858_v0 }
 0x249   : > { %v2994_v60 = vpop.f32.mrb[24].mxu0 }
 0x24a   : > { %v2106_v36 = vadd.f32 %v2994_v60, %v4829_v57  ;;  %v2097_v13 = vpop.f32.mrb[25].mxu0  ;;  %v2552_v60 = vand.u32 127, %v2551_v45 }
 0x24b   : > { %v2098_v41 = vadd.f32 %v4829_v57, %v2097_v13  ;;  %v2995_v31 = vpop.f32.mrb[26].mxu0 }
 0x24c   : > { %v2109_v24 = vadd.f32 %v2995_v31, %v4829_v57  ;;  %v2100_v6 = vpop.f32.mrb[27].mxu0  ;;  %v2154_v50 = vmax.f32 %v2106_v36, 0.0 }
 0x24d   : > { %v2101_v25 = vadd.f32 %v4829_v57, %v2100_v6  ;;  %v2152_v56 = vmax.f32 %v2098_v41, 0.0 }
 0x24e   : > { %v2155_v54 = vmax.f32 %v2109_v24, 0.0 }
 0x24f   : > { %v2153_v52 = vmax.f32 %v2101_v25, 0.0 }
 0x250   : > { %v3064_v53 = vpack.c.bf16 %v2155_v54, %v2154_v50 }
 0x251   : > { %v3060_v46 = vpack.c.bf16 %v2153_v52, %v2152_v56 }
 0x253   : > { %3061 = vmatprep.subr.bf16.mxu1 %v3060_v46 }
 0x254   : > { %3063 = vmatpush3.bf16.msra.mxu1 %v4868_v28 }
 0x255   : > { %3065 = vmatprep.subr.bf16.mxu1 %v3064_v53 }
 0x258   : > { %3067 = vmatpush3.bf16.msra.mxu1 %v4866_v58  ;;  %v2868_v58 = vld [vmem:[%s5024_s4 + $0x20] sm:$0xff] }
 0x266   : > { %v2998_v0 = vpop.f32.mrb[28].mxu0 }
 0x267   : > { %v2122_v22 = vadd.f32 %v2998_v0, %v4829_v57  ;;  %v2113_v47 = vpop.f32.mrb[29].mxu0 }
 0x268   : > { %v2114_v49 = vadd.f32 %v4829_v57, %v2113_v47  ;;  %v2999_v59 = vpop.f32.mrb[30].mxu0 }
 0x269   : > { %v2125_v37 = vadd.f32 %v2999_v59, %v4829_v57  ;;  %v2116_v62 = vpop.f32.mrb[31].mxu0  ;;  %v2158_v30 = vmax.f32 %v2122_v22, 0.0 }
 0x26a   : > { %v2117_v63 = vadd.f32 %v4829_v57, %v2116_v62  ;;  %v2156_v32 = vmax.f32 %v2114_v49, 0.0  ;;  %v3077_v57 = vpack.c.bf16 %v2869_v3, %v2868_v58 }
 0x26b   : > { %v2159_v43 = vmax.f32 %v2125_v37, 0.0 }
 0x26c   : > { %v2157_v15 = vmax.f32 %v2117_v63, 0.0 }
 0x26d   : > { %v3072_v28 = vpack.c.bf16 %v2159_v43, %v2158_v30 }
 0x26e   : > { %v3068_v61 = vpack.c.bf16 %v2157_v15, %v2156_v32 }
 0x270   : > { %3069 = vmatprep.subr.bf16.mxu1 %v3068_v61 }
 0x271   : > { %3071 = vmatpush3.bf16.msra.mxu1 %v4876_v5  ;;  %v2870_v5 = vld [vmem:[%s5024_s4 + $0x30] sm:$0xff] }
 0x272   : > { %3073 = vmatprep.subr.bf16.mxu1 %v3072_v28  ;;  %v3080_v8 = vpack.c.bf16 %v2871_v7, %v2870_v5 }
 0x275   : > { %3075 = vmatpush3.bf16.msra.mxu1 %v4874_v4  ;;  %v3878_v4 = vmov 0.0  }
 0x276   : > { %3076 = vmatprep.subr.bf16.mxu1 %v3876_v34 }
 0x278   : > { %2229 = vmatmul.mubr.f32.vlgmr.msra.gmra.mrb[0].mxu1 %v4881_v2  ;;  %v2234_v2 = vld [vmem:[%s5024_s4] sm:$0xff] }
 0x279   : > { %3078 = vmatpush3.bf16.msra.mxu1 %v3077_v57  ;;  %3008 = vmatprep.mubr.msk.f32.mxu1 %vm3877_vm10, %v3878_v4  ;;  %v3083_v51 = vpack.c.bf16 %v2235_v10, %v2234_v2 }
 0x27a   : > { %3079 = vmatprep.subr.bf16.mxu1 %v3876_v34 }
 0x27d   : > { %3081 = vmatpush3.bf16.msra.mxu1 %v3080_v8 }
 0x27e   : > { %3082 = vmatprep.subr.bf16.mxu1 %v3876_v34 }
 0x34b   : > { %v2939_v40 = vpop.f32.mrb[0].mxu1 }
 0x34c   : > { %v2940_v1 = vpop.f32.mrb[1].mxu1 }
 0x34d   : > { %v2941_v12 = vadd.f32 %v2940_v1, %v2939_v40 }
 0x34f   : > { %v2244_v11 = vrot.slane %v2941_v12, 1  ;;  %v2394_v38 = vrot.slane %v2941_v12, 2  ;;  %v2473_v39 = vrot.slane %v2941_v12, 3 }
 0x351   : > { %3009 = vmatmul.mubr.msk.f32.vlgmr.msra.gmra.mrb[2].mxu1 %vm1838_vm8, %v2244_v11 }
 0x352   : > { %3084 = vmatpush3.bf16.msra.mxu1 %v3083_v51  ;;  %3019 = vmatprep.mubr.msk.f32.mxu1 %vm3877_vm10, %v3878_v4 }
 0x353   : > { %3085 = vmatprep.subr.bf16.mxu1 %v3876_v34 }
 0x356   : > { %3087 = vmatpush3.bf16.msra.mxu1 %v3086_v20 }
 0x357   : > { %3088 = vmatprep.subr.bf16.mxu1 %v3876_v34 }
 0x359   : > { %3020 = vmatmul.mubr.msk.f32.vlgmr.msra.gmra.mrb[2].mxu1 %vm1838_vm8, %v2941_v12 }
 0x35a   : > { %3090 = vmatpush3.bf16.msra.mxu1 %v3089_v23  ;;  %3030 = vmatprep.mubr.msk.f32.mxu1 %vm3877_vm10, %v3878_v4 }
 0x35b   : > { %3091 = vmatprep.subr.bf16.mxu1 %v3876_v34 }
 0x35e   : > { %3093 = vmatpush3.bf16.msra.mxu1 %v3092_v55 }
 0x35f   : > { %3094 = vmatprep.subr.bf16.mxu1 %v3876_v34 }
 0x361   : > { %3031 = vmatmul.mubr.msk.f32.vlgmr.msra.gmra.mrb[2].mxu1 %vm1838_vm8, %v2394_v38 }
 0x362   : > { %3096 = vmatpush3.bf16.msra.mxu1 %v3095_v33  ;;  %3041 = vmatprep.mubr.msk.f32.mxu1 %vm3877_vm10, %v3878_v4 }
 0x363   : > { %3097 = vmatprep.subr.bf16.mxu1 %v3876_v34 }
 0x366   : > { %3099 = vmatpush3.bf16.msra.mxu1 %v3098_v9 }
 0x369   : > { %3042 = vmatmul.mubr.msk.f32.vlgmr.msra.gmra.mrb[2].mxu1 %vm1838_vm8, %v2473_v39 }
 0x43c   : > { %v2542_v42 = vpop.f32.mrb[2].mxu1 }
 0x43d   : > { %v3043_v44 = vpop.f32.mrb[3].mxu1  ;;  %v2548_v48 = vsel %vm2547_vm11, %v2542_v42, -inf }
 0x43e   : > { %2549 = vmax.xlane.f32.xlu0 %v2548_v48 }
 0x4cb   : > { %v2550_v36 = vpop.xlane.xlu0 %2549 }
 0x4cc   : > { %vm2553_vm12 = vcmp.eq.f32.partialorder %v2542_v42, %v2550_v36 }
 0x4cd   : > { %v2554_v13 = vsel %vm2553_vm12, %v2552_v60, 4 }
 0x4ce   : > { %v2555_v41 = vsel %vm2547_vm11, %v2554_v13, 2147483647 }
 0x4cf   : > { %v2557_v31 = vshra.s32 %v2555_v41, 16  ;;  %v2556_v6 = vand.u32 65535, %v2555_v41 }
 0x4d1   : > { %v2559_v24 = vcvt.s32.f32 %v2557_v31  ;;  %v2558_v50 = vcvt.s32.f32 %v2556_v6 }
 0x4d3   : > { %2560 = vmin.xlane.f32.xlu1 %v2559_v24 }
 0x560   : > { %v2561_v25 = vpop.xlane.xlu1 %2560 }
 0x561   : > { %vm2562_vm13 = vcmp.eq.f32.partialorder %v2559_v24, %v2561_v25  ;;  %v2567_v56 = vcvt.f32.s32 %v2561_v25 }
 0x562   : > { %v2563_v54 = vsel %vm2562_vm13, %v2558_v50, inf }
 0x563   : > { %2564 = vmin.xlane.f32.xlu0 %v2563_v54  ;;  %v2568_v53 = vshll.u32 %v2567_v56, 16 }
 0x5f0   : > { %v2565_v52 = vpop.xlane.xlu0 %2564 }
 0x5f1   : > { %v2566_v46 = vcvt.f32.s32 %v2565_v52 }
 0x5f3   : > { %v2569_v0 = vadd.s32 %v2568_v53, %v2566_v46 }
 0x5f5   : > { %vm2570_vm14 = vcmp.eq.s32.totalorder %v2552_v60, %v2569_v0 }
 0x5f6   : > { %v2884_v22 = vsel %vm2570_vm14, 1.0, %v3878_v4 }
 0x5f7   : > { %2573 = vst.msk [vmem:[%s283_s20] sm:$0x1] %vm2547_vm11, %v2884_v22 }
 0x5f8   : > { %3817 = shalt.err (!%p3814_p3)
}
 0x5f9   : > { %s3818_s13 = scalar_lea.hbm %s4976_s6, 16  ;;  %s3822_s16 = scalar_lea.hbm %s5027_s7, 32 }
 0x5fa   : > { %p3819_p4 = scmp.ne.s32.totalorder %s4976_s6, %s3818_s13  ;;  %p3823_p9 = scmp.lt.u32.totalorder %s4976_s6, %s5027_s7 }
 0x5fb   : > { %p3824_p10 = scmp.lt.u32.totalorder %s3822_s16, %s3818_s13  ;;  %p3826_p12 = scmp.lt.u32.totalorder %s3818_s13, %s4976_s6 }
 0x5fc   : > { %p3820_p7 = pnand %p3819_p4, %p3958_p5 }
 0x5fd   : > { %p3825_p11 = por %p3824_p10, %p3823_p9 }
 0x5fe   : > { %p3821_p8 = pneg %p3820_p7 }
 0x5ff   : > { %p3827_p13 = por %p3826_p12, %p3825_p11 }
 0x601   : > { %p3828_p0 = pnand %p3827_p13, %p3821_p8 }
 0x603   : > { %3831 = shalt.err (!%p3828_p0)
}
 0x604   : > { %3108 = dma.vmem_to_hbm [thread:$0]  (%p3958_p5), %s4978_s21, 16, %s4976_s6, %s2575_s29  }
 0x605 PF: > { %p3114_p1 = scmp.ge.s32.totalorder %s3866_s27, 2  ;;  %s2599_s19 = sand.u32 1, %s3854_s24  }
 0x606   : > { %s2600_s20 = scalar_lea.sflag [#allocation4], %s2599_s19 }
 0x607   : > { %p3111_p2 = pnand %p3114_p1, %p3962_p6 }
 0x609   : > { %3849 = dma.done.wait (!%p3111_p2), %s2600_s20, 16  }
 0x60a   : > { %3851 = vsyncadd (!%p3111_p2), %s2600_s20, 4294967280  ;;  %p19_p3 = scmp.ge.s32.totalorder %s3945_s28, 4   ;;  %s5030_s24 = smov %s3858_s25 }
 0x60b   : > { %s5031_s25 = smov %s3862_s26  ;;  %s5032_s26 = smov %s3956_s8 }
 0x60c   : > { %s5033_s27 = smov %s3945_s28  ;;  %21 = sbr.rel (!%p19_p3) target bundleno = 3 (0x3), region = 91 }
 0x613   :  { %2604 = vsyncpa [#allocation4], 1 }
 0x614   :  { %2606 = vsyncpa [#allocation4 + $0x1], 1 }

</bundles_post_ra>
